<compile_context>
chip_gen: v7x
topology: tpu7x:2x2x1
jax: 0.10.0
libtpu: 0.0.40
codegen_flags: <defaults>
</compile_context>

<pallas_src>
import functools

import jax
import jax.numpy as jnp
from jax.experimental import pallas as pl
from jax.experimental.pallas import tpu as pltpu

HIDDEN = 6
INPUT = 6
NUM_LAYERS = 2

_VMEM = pl.BlockSpec(memory_space=pltpu.MemorySpace.VMEM)


# ---------------------------------------------------------------------------
# Fused kernel
# ---------------------------------------------------------------------------
def _aux_fused_kernel(T, B, H,
                      x2_ref, mask_ref,
                      h00_ref, c00_ref, h01_ref, c01_ref,
                      wih0_ref, whh0_ref, b0_ref,
                      wih1_ref, whh1_ref, b1_ref,
                      fcw_ref, fcb_ref,
                      out_ref,
                      x1p_ref):
    """Whole AUX_Model forward.

    x2_ref  : (T*B, 2D)   row-block t = [x(t) | x(T-1-t)]          (time-major, batch padded)
    mask_ref: (T*B, 2H)   inverted-dropout multipliers {0, 2} (loop-order layout)
    h0*/c0* : (B, 2H)     per-layer initial hidden/cell, lanes = [fw | bw]
    wih0    : (2D, 8H)    block-diag input weights, gate cols = [i_fw,i_bw|f_fw,f_bw|g_fw,g_bw|o_fw,o_bw]
    wih1    : (4H, 8H)    layer-1 input weights routed for the packed scratch layout (see store0)
    whh*    : (2H, 8H)    block-diagonal hidden weights (fw rows | bw rows), same gate-col order
    b*      : (1, 8H)     bias_ih + bias_hh, same column layout
    fcw     : (2H, H), fcb: (1, H)
    out_ref : (B, H)
    x1p_ref : (T*B, 4H)   scratch: packed layer-1 input, row-block s =
                          [y0(s).fw | y0(T-1-s).bw | y0(T-1-s).fw | y0(s).bw]
    """
    H2, H4, H8 = 2 * H, 4 * H, 8 * H

    # Per-lane constants for the fused gate activation: sigmoid(x)=0.5*tanh(0.5x)+0.5 on i/f/o
    # columns, tanh(x) on g columns -> all 4 gates x 2 directions in ONE EUP tanh push per step.
    lane = jax.lax.broadcasted_iota(jnp.int32, (1, H8), 1)
    is_g = (lane >= 2 * H2) & (lane < 3 * H2)
    sg = jnp.where(is_g, 1.0, 0.5).astype(jnp.float32)
    off = jnp.where(is_g, 0.0, 0.5).astype(jnp.float32)

    def run_bilayer(gx, h_cat, c_cat, whh, b, store=None):
        """Run fw+bw directions of one layer in a single unrolled loop.

        gx: (T*B, 8H) precomputed input-projections in the packed gate-column layout.
        Returns (h_cat after step 0, h_cat after step T-1); each is (B, 2H) = [fw | bw].
        """
        h_first = None
        for t in range(T):
            # One MXU push covers both directions and all 4 gates.
            pre = (gx[t * B:(t + 1) * B, :]
                   + jnp.dot(h_cat, whh, preferred_element_type=jnp.float32)
                   + b)                                                  # (B, 8H)
            act = sg * jnp.tanh(sg * pre) + off                          # fused sigmoid/tanh
            i_g = act[:, 0:H2]
            f_g = act[:, H2:2 * H2]
            g_g = act[:, 2 * H2:3 * H2]
            o_g = act[:, 3 * H2:4 * H2]
            c_cat = f_g * c_cat + i_g * g_g                              # (B, 2H)
            h_cat = o_g * jnp.tanh(c_cat)                                # (B, 2H)
            if store is not None:
                store(t, h_cat)
            if t == 0:
                h_first = h_cat
        return h_first, h_cat

    # ---------------- layer 0 ----------------
    gx0 = jnp.dot(x2_ref[...], wih0_ref[...], preferred_element_type=jnp.float32)   # (T*B, 8H)

    def store0(t, h):
        # h = [h_fw(t) | h_bw(T-1-t)]; dropout applies only to the output fed to layer 1,
        # not to the recurrent state.  Both scratch copies use the same dropped values.
        hd = h * mask_ref[t * B:(t + 1) * B, :]
        x1p_ref[t * B:(t + 1) * B, 0:H2] = hd              # forward-time copy
        x1p_ref[(T - 1 - t) * B:(T - t) * B, H2:H4] = hd   # time-reversed copy

    run_bilayer(gx0, h00_ref[...], c00_ref[...], whh0_ref[...], b0_ref[...], store=store0)

    # ---------------- layer 1 ----------------
    gx1 = jnp.dot(x1p_ref[...], wih1_ref[...], preferred_element_type=jnp.float32)   # (T*B, 8H)
    h1_first, h1_last = run_bilayer(gx1, h01_ref[...], c01_ref[...],
                                    whh1_ref[...], b1_ref[...])

    # out[:, -1] = [fw hidden at t=T-1 | bw hidden at t=T-1 (bw loop step 0)]
    y_last = jnp.concatenate([h1_last[:, 0:H], h1_first[:, H:H2]], axis=-1)           # (B, 2H)

    # ---------------- fc(relu(.)) ----------------
    y_last = jnp.maximum(y_last, 0.0)
    out_ref[...] = (jnp.dot(y_last, fcw_ref[...], preferred_element_type=jnp.float32)
                    + fcb_ref[...])


# ---------------------------------------------------------------------------
# Parameters (mirrors nn.LSTM / nn.Linear init; packed for the fused kernel)
# ---------------------------------------------------------------------------
def init_params(key):
    H, D = HIDDEN, INPUT
    keys = iter(jax.random.split(key, NUM_LAYERS * 2 * 4 + 2))

    def uni(shape, bound):
        return jax.random.uniform(next(keys), shape, jnp.float32, -bound, bound)

    bound = 1.0 / (H ** 0.5)
    raw = []
    for layer in range(NUM_LAYERS):
        din = D if layer == 0 else 2 * H            # bidirectional -> layer 1 input is 2H
        dirs = []
        for _ in range(2):                          # fw, bw
            dirs.append(dict(
                w_ih=uni((4 * H, din), bound),      # PyTorch layout, gate rows [i,f,g,o]
                w_hh=uni((4 * H, H), bound),
                b_ih=uni((4 * H,), bound),
                b_hh=uni((4 * H,), bound)))
        raw.append(dirs)

    def set_gate_cols(mat, row_slice, w, d):
        # w: (4H, width) torch gate-row layout [i,f,g,o]; d: 0 = fw, 1 = bw.
        # gate-column layout (width 8H): gate g -> cols [g*2H + d*H : g*2H + (d+1)*H]
        for g in range(4):
            cols = slice(g * 2 * H + d * H, g * 2 * H + (d + 1) * H)
            mat = mat.at[row_slice, cols].set(jnp.transpose(w[g * H:(g + 1) * H, :]))
        return mat

    def pack_bias(fw, bw):
        b_fw = fw["b_ih"] + fw["b_hh"]
        b_bw = bw["b_ih"] + bw["b_hh"]
        b = jnp.zeros((1, 8 * H), jnp.float32)
        for g in range(4):
            b = b.at[0, g * 2 * H:g * 2 * H + H].set(b_fw[g * H:(g + 1) * H])
            b = b.at[0, g * 2 * H + H:(g + 1) * 2 * H].set(b_bw[g * H:(g + 1) * H])
        return b

    params = {}

    # ----- layer 0: packed input rows = [x(t) (D) | x(T-1-t) (D)] -----
    fw, bw = raw[0]
    wih0 = jnp.zeros((2 * D, 8 * H), jnp.float32)
    wih0 = set_gate_cols(wih0, slice(0, D), fw["w_ih"], 0)
    wih0 = set_gate_cols(wih0, slice(D, 2 * D), bw["w_ih"], 1)
    whh0 = jnp.zeros((2 * H, 8 * H), jnp.float32)
    whh0 = set_gate_cols(whh0, slice(0, H), fw["w_hh"], 0)
    whh0 = set_gate_cols(whh0, slice(H, 2 * H), bw["w_hh"], 1)
    params["l0"] = {"wih": wih0, "whh": whh0, "b": pack_bias(fw, bw)}

    # ----- layer 1: packed input rows = [y0(s).fw | y0(T-1-s).bw | y0(T-1-s).fw | y0(s).bw] -----
    fw, bw = raw[1]
    wih1 = jnp.zeros((4 * H, 8 * H), jnp.float32)
    wih1 = set_gate_cols(wih1, slice(0, H),         fw["w_ih"][:, 0:H],     0)  # y0(s).fw  -> fw gates
    wih1 = set_gate_cols(wih1, slice(3 * H, 4 * H), fw["w_ih"][:, H:2 * H], 0)  # y0(s).bw  -> fw gates
    wih1 = set_gate_cols(wih1, slice(2 * H, 3 * H), bw["w_ih"][:, 0:H],     1)  # y0(r).fw  -> bw gates
    wih1 = set_gate_cols(wih1, slice(H, 2 * H),     bw["w_ih"][:, H:2 * H], 1)  # y0(r).bw  -> bw gates
    whh1 = jnp.zeros((2 * H, 8 * H), jnp.float32)
    whh1 = set_gate_cols(whh1, slice(0, H), fw["w_hh"], 0)
    whh1 = set_gate_cols(whh1, slice(H, 2 * H), bw["w_hh"], 1)
    params["l1"] = {"wih": wih1, "whh": whh1, "b": pack_bias(fw, bw)}

    bound_fc = 1.0 / ((2 * H) ** 0.5)
    fc_w = uni((H, 2 * H), bound_fc)          # PyTorch Linear weight (out=6, in=12)
    fc_b = uni((H,), bound_fc)
    params["fc_w"] = jnp.transpose(fc_w)      # (12, 6) for x @ w
    params["fc_b"] = fc_b[None, :]            # (1, 6)
    return params


# ---------------------------------------------------------------------------
# Forward pass (mirrors AUX_Model.forward) — single pallas_call
# ---------------------------------------------------------------------------
@functools.partial(jax.jit, static_argnames=("training",))
def aux_model_forward(time_feature, params, rng, training=True):
    """time_feature: (B, T, 6) float32 -> (B, 6) float32."""
    B, T, D = time_feature.shape
    H = HIDDEN
    Bp = max(8, ((B + 7) // 8) * 8)           # pad batch so row blocks are sublane-aligned

    # batch-first (B, T, D) -> time-major, batch-padded, with the time-reversed stream packed
    # along lanes so the in-kernel layer-0 input projection is one dense block-diagonal matmul.
    xt = jnp.transpose(time_feature.astype(jnp.float32), (1, 0, 2))       # (T, B, D)
    if Bp != B:
        xt = jnp.pad(xt, ((0, 0), (0, Bp - B), (0, 0)))
    x_fwd = xt.reshape(T * Bp, D)
    x_rev = jnp.flip(xt, axis=0).reshape(T * Bp, D)
    x2 = jnp.concatenate([x_fwd, x_rev], axis=-1)                          # (T*Bp, 2D)

    k_h, k_c, k_drop = jax.random.split(rng, 3)
    # Mirrors `torch.rand(4, B, 6)` random initial states (l0_fw, l0_bw, l1_fw, l1_bw),
    # packed per layer as [fw | bw] lanes.  Padded batch rows are discarded at the end.
    h0 = jax.random.uniform(k_h, (NUM_LAYERS, Bp, 2 * H), jnp.float32)
    c0 = jax.random.uniform(k_c, (NUM_LAYERS, Bp, 2 * H), jnp.float32)

    if training:  # nn.LSTM inter-layer dropout (p=0.5), inverted scaling
        keep = jax.random.bernoulli(k_drop, 0.5, (T * Bp, 2 * H))
        mask = keep.astype(jnp.float32) * 2.0
    else:
        mask = jnp.ones((T * Bp, 2 * H), jnp.float32)

    kernel = functools.partial(_aux_fused_kernel, T, Bp, H)
    out = pl.pallas_call(
        kernel,
        out_shape=jax.ShapeDtypeStruct((Bp, H), jnp.float32),
        in_specs=[_VMEM] * 14,
        out_specs=_VMEM,
        scratch_shapes=[pltpu.VMEM((T * Bp, 4 * H), jnp.float32)],
    )(x2, mask,
      h0[0], c0[0], h0[1], c0[1],
      params["l0"]["wih"], params["l0"]["whh"], params["l0"]["b"],
      params["l1"]["wih"], params["l1"]["whh"], params["l1"]["b"],
      params["fc_w"], params["fc_b"])
    return out[:B]


if __name__ == "__main__":
    key = jax.random.PRNGKey(0)
    k_params, k_x, k_state = jax.random.split(key, 3)

    params = init_params(k_params)

    B, T = 2, 8
    time_feature = jax.random.normal(k_x, (B, T, INPUT), jnp.float32)

    out = aux_model_forward(time_feature, params, k_state)
    out = jax.block_until_ready(out)
    assert out.shape == (B, HIDDEN), out.shape
    assert bool(jnp.all(jnp.isfinite(out)))
    print("KERNEL_OK")
</pallas_src>

<mosaic_0001>
module attributes {stable_mosaic.version = 11 : i64} {
  func.func @_aux_fused_kernel(%arg0: memref<64x12xf32, #tpu.memory_space<vmem>>, %arg1: memref<64x12xf32, #tpu.memory_space<vmem>>, %arg2: memref<8x12xf32, #tpu.memory_space<vmem>>, %arg3: memref<8x12xf32, #tpu.memory_space<vmem>>, %arg4: memref<8x12xf32, #tpu.memory_space<vmem>>, %arg5: memref<8x12xf32, #tpu.memory_space<vmem>>, %arg6: memref<12x48xf32, #tpu.memory_space<vmem>>, %arg7: memref<12x48xf32, #tpu.memory_space<vmem>>, %arg8: memref<1x48xf32, #tpu.memory_space<vmem>>, %arg9: memref<24x48xf32, #tpu.memory_space<vmem>>, %arg10: memref<12x48xf32, #tpu.memory_space<vmem>>, %arg11: memref<1x48xf32, #tpu.memory_space<vmem>>, %arg12: memref<12x6xf32, #tpu.memory_space<vmem>>, %arg13: memref<1x6xf32, #tpu.memory_space<vmem>>, %arg14: memref<8x6xf32, #tpu.memory_space<vmem>>, %arg15: memref<64x24xf32, #tpu.memory_space<vmem>>) attributes {dimension_semantics = [], scalar_prefetch = 0 : i64, scratch_operands = 1 : i64, tpu.core_type = #tpu.core_type<tc>} {
    %0 = tpu.iota {dimensions = array<i32: 1>} : vector<1x48xi32>
    %c24_i32 = arith.constant 24 : i32
    %1 = vector.broadcast %c24_i32 : i32 to vector<1x48xi32>
    %2 = arith.cmpi sge, %0, %1 : vector<1x48xi32>
    %c36_i32 = arith.constant 36 : i32
    %3 = vector.broadcast %c36_i32 : i32 to vector<1x48xi32>
    %4 = arith.cmpi slt, %0, %3 : vector<1x48xi32>
    %5 = arith.andi %2, %4 : vector<1x48xi1>
    %cst = arith.constant 1.000000e+00 : f32
    %cst_0 = arith.constant 5.000000e-01 : f32
    %6 = vector.broadcast %cst : f32 to vector<1x48xf32>
    %7 = vector.broadcast %cst_0 : f32 to vector<1x48xf32>
    %8 = arith.select %5, %6, %7 : vector<1x48xi1>, vector<1x48xf32>
    %cst_1 = arith.constant 0.000000e+00 : f32
    %cst_2 = arith.constant 5.000000e-01 : f32
    %9 = vector.broadcast %cst_1 : f32 to vector<1x48xf32>
    %10 = vector.broadcast %cst_2 : f32 to vector<1x48xf32>
    %11 = arith.select %5, %9, %10 : vector<1x48xi1>, vector<1x48xf32>
    %c0 = arith.constant 0 : index
    %c0_3 = arith.constant 0 : index
    %12 = vector.load %arg0[%c0, %c0_3] : memref<64x12xf32, #tpu.memory_space<vmem>>, vector<64x12xf32>
    %c0_4 = arith.constant 0 : index
    %c0_5 = arith.constant 0 : index
    %13 = vector.load %arg6[%c0_4, %c0_5] : memref<12x48xf32, #tpu.memory_space<vmem>>, vector<12x48xf32>
    %cst_6 = arith.constant dense<0.000000e+00> : vector<64x48xf32>
    %14 = tpu.matmul %12, %13, %cst_6 {dimension_numbers = #tpu.dot_dimension_numbers<[1], [0], [0], [1], [0, 0, 1, 1], [], []>} : vector<64x12xf32>, vector<12x48xf32>, vector<64x48xf32> -> vector<64x48xf32>
    %c0_7 = arith.constant 0 : index
    %c0_8 = arith.constant 0 : index
    %15 = vector.load %arg2[%c0_7, %c0_8] : memref<8x12xf32, #tpu.memory_space<vmem>>, vector<8x12xf32>
    %c0_9 = arith.constant 0 : index
    %c0_10 = arith.constant 0 : index
    %16 = vector.load %arg3[%c0_9, %c0_10] : memref<8x12xf32, #tpu.memory_space<vmem>>, vector<8x12xf32>
    %c0_11 = arith.constant 0 : index
    %c0_12 = arith.constant 0 : index
    %17 = vector.load %arg7[%c0_11, %c0_12] : memref<12x48xf32, #tpu.memory_space<vmem>>, vector<12x48xf32>
    %c0_13 = arith.constant 0 : index
    %c0_14 = arith.constant 0 : index
    %18 = vector.load %arg8[%c0_13, %c0_14] : memref<1x48xf32, #tpu.memory_space<vmem>>, vector<1x48xf32>
    %19 = vector.extract_strided_slice %14 {offsets = [0, 0], sizes = [8, 48], strides = [1, 1]} : vector<64x48xf32> to vector<8x48xf32>
    %cst_15 = arith.constant dense<0.000000e+00> : vector<8x48xf32>
    %20 = tpu.matmul %15, %17, %cst_15 {dimension_numbers = #tpu.dot_dimension_numbers<[1], [0], [0], [1], [0, 0, 1, 1], [], []>} : vector<8x12xf32>, vector<12x48xf32>, vector<8x48xf32> -> vector<8x48xf32>
    %21 = arith.addf %19, %20 : vector<8x48xf32>
    %22 = vector.broadcast %18 : vector<1x48xf32> to vector<8x48xf32>
    %23 = arith.addf %21, %22 : vector<8x48xf32>
    %24 = vector.broadcast %8 : vector<1x48xf32> to vector<8x48xf32>
    %25 = arith.mulf %24, %23 : vector<8x48xf32>
    %26 = math.tanh %25 : vector<8x48xf32>
    %27 = vector.broadcast %8 : vector<1x48xf32> to vector<8x48xf32>
    %28 = arith.mulf %27, %26 : vector<8x48xf32>
    %29 = vector.broadcast %11 : vector<1x48xf32> to vector<8x48xf32>
    %30 = arith.addf %28, %29 : vector<8x48xf32>
    %31 = vector.extract_strided_slice %30 {offsets = [0, 0], sizes = [8, 12], strides = [1, 1]} : vector<8x48xf32> to vector<8x12xf32>
    %32 = vector.extract_strided_slice %30 {offsets = [0, 12], sizes = [8, 12], strides = [1, 1]} : vector<8x48xf32> to vector<8x12xf32>
    %33 = vector.extract_strided_slice %30 {offsets = [0, 24], sizes = [8, 12], strides = [1, 1]} : vector<8x48xf32> to vector<8x12xf32>
    %34 = vector.extract_strided_slice %30 {offsets = [0, 36], sizes = [8, 12], strides = [1, 1]} : vector<8x48xf32> to vector<8x12xf32>
    %35 = arith.mulf %32, %16 : vector<8x12xf32>
    %36 = arith.mulf %31, %33 : vector<8x12xf32>
    %37 = arith.addf %35, %36 : vector<8x12xf32>
    %38 = math.tanh %37 : vector<8x12xf32>
    %39 = arith.mulf %34, %38 : vector<8x12xf32>
    %c0_16 = arith.constant 0 : index
    %c0_17 = arith.constant 0 : index
    %40 = vector.load %arg1[%c0_16, %c0_17] : memref<64x12xf32, #tpu.memory_space<vmem>>, vector<8x12xf32>
    %41 = arith.mulf %39, %40 : vector<8x12xf32>
    %c0_18 = arith.constant 0 : index
    %c0_19 = arith.constant 0 : index
    %42 = vector.load %arg15[%c0_18, %c0_19] : memref<64x24xf32, #tpu.memory_space<vmem>>, vector<8x12xf32>
    tpu.vector_store %arg15[%c0_18, %c0_19], %41 {strides = array<i32>} : memref<64x24xf32, #tpu.memory_space<vmem>>, vector<8x12xf32>,
    %c56 = arith.constant 56 : index
    %c12 = arith.constant 12 : index
    %43 = vector.load %arg15[%c56, %c12] : memref<64x24xf32, #tpu.memory_space<vmem>>, vector<8x12xf32>
    tpu.vector_store %arg15[%c56, %c12], %41 {strides = array<i32>} : memref<64x24xf32, #tpu.memory_space<vmem>>, vector<8x12xf32>,
    %44 = vector.extract_strided_slice %14 {offsets = [8, 0], sizes = [8, 48], strides = [1, 1]} : vector<64x48xf32> to vector<8x48xf32>
    %cst_20 = arith.constant dense<0.000000e+00> : vector<8x48xf32>
    %45 = tpu.matmul %39, %17, %cst_20 {dimension_numbers = #tpu.dot_dimension_numbers<[1], [0], [0], [1], [0, 0, 1, 1], [], []>} : vector<8x12xf32>, vector<12x48xf32>, vector<8x48xf32> -> vector<8x48xf32>
    %46 = arith.addf %44, %45 : vector<8x48xf32>
    %47 = vector.broadcast %18 : vector<1x48xf32> to vector<8x48xf32>
    %48 = arith.addf %46, %47 : vector<8x48xf32>
    %49 = vector.broadcast %8 : vector<1x48xf32> to vector<8x48xf32>
    %50 = arith.mulf %49, %48 : vector<8x48xf32>
    %51 = math.tanh %50 : vector<8x48xf32>
    %52 = vector.broadcast %8 : vector<1x48xf32> to vector<8x48xf32>
    %53 = arith.mulf %52, %51 : vector<8x48xf32>
    %54 = vector.broadcast %11 : vector<1x48xf32> to vector<8x48xf32>
    %55 = arith.addf %53, %54 : vector<8x48xf32>
    %56 = vector.extract_strided_slice %55 {offsets = [0, 0], sizes = [8, 12], strides = [1, 1]} : vector<8x48xf32> to vector<8x12xf32>
    %57 = vector.extract_strided_slice %55 {offsets = [0, 12], sizes = [8, 12], strides = [1, 1]} : vector<8x48xf32> to vector<8x12xf32>
    %58 = vector.extract_strided_slice %55 {offsets = [0, 24], sizes = [8, 12], strides = [1, 1]} : vector<8x48xf32> to vector<8x12xf32>
    %59 = vector.extract_strided_slice %55 {offsets = [0, 36], sizes = [8, 12], strides = [1, 1]} : vector<8x48xf32> to vector<8x12xf32>
    %60 = arith.mulf %57, %37 : vector<8x12xf32>
    %61 = arith.mulf %56, %58 : vector<8x12xf32>
    %62 = arith.addf %60, %61 : vector<8x12xf32>
    %63 = math.tanh %62 : vector<8x12xf32>
    %64 = arith.mulf %59, %63 : vector<8x12xf32>
    %c8 = arith.constant 8 : index
    %c0_21 = arith.constant 0 : index
    %65 = vector.load %arg1[%c8, %c0_21] : memref<64x12xf32, #tpu.memory_space<vmem>>, vector<8x12xf32>
    %66 = arith.mulf %64, %65 : vector<8x12xf32>
    %c8_22 = arith.constant 8 : index
    %c0_23 = arith.constant 0 : index
    %67 = vector.load %arg15[%c8_22, %c0_23] : memref<64x24xf32, #tpu.memory_space<vmem>>, vector<8x12xf32>
    tpu.vector_store %arg15[%c8_22, %c0_23], %66 {strides = array<i32>} : memref<64x24xf32, #tpu.memory_space<vmem>>, vector<8x12xf32>,
    %c48 = arith.constant 48 : index
    %c12_24 = arith.constant 12 : index
    %68 = vector.load %arg15[%c48, %c12_24] : memref<64x24xf32, #tpu.memory_space<vmem>>, vector<8x12xf32>
    tpu.vector_store %arg15[%c48, %c12_24], %66 {strides = array<i32>} : memref<64x24xf32, #tpu.memory_space<vmem>>, vector<8x12xf32>,
    %69 = vector.extract_strided_slice %14 {offsets = [16, 0], sizes = [8, 48], strides = [1, 1]} : vector<64x48xf32> to vector<8x48xf32>
    %cst_25 = arith.constant dense<0.000000e+00> : vector<8x48xf32>
    %70 = tpu.matmul %64, %17, %cst_25 {dimension_numbers = #tpu.dot_dimension_numbers<[1], [0], [0], [1], [0, 0, 1, 1], [], []>} : vector<8x12xf32>, vector<12x48xf32>, vector<8x48xf32> -> vector<8x48xf32>
    %71 = arith.addf %69, %70 : vector<8x48xf32>
    %72 = vector.broadcast %18 : vector<1x48xf32> to vector<8x48xf32>
    %73 = arith.addf %71, %72 : vector<8x48xf32>
    %74 = vector.broadcast %8 : vector<1x48xf32> to vector<8x48xf32>
    %75 = arith.mulf %74, %73 : vector<8x48xf32>
    %76 = math.tanh %75 : vector<8x48xf32>
    %77 = vector.broadcast %8 : vector<1x48xf32> to vector<8x48xf32>
    %78 = arith.mulf %77, %76 : vector<8x48xf32>
    %79 = vector.broadcast %11 : vector<1x48xf32> to vector<8x48xf32>
    %80 = arith.addf %78, %79 : vector<8x48xf32>
    %81 = vector.extract_strided_slice %80 {offsets = [0, 0], sizes = [8, 12], strides = [1, 1]} : vector<8x48xf32> to vector<8x12xf32>
    %82 = vector.extract_strided_slice %80 {offsets = [0, 12], sizes = [8, 12], strides = [1, 1]} : vector<8x48xf32> to vector<8x12xf32>
    %83 = vector.extract_strided_slice %80 {offsets = [0, 24], sizes = [8, 12], strides = [1, 1]} : vector<8x48xf32> to vector<8x12xf32>
    %84 = vector.extract_strided_slice %80 {offsets = [0, 36], sizes = [8, 12], strides = [1, 1]} : vector<8x48xf32> to vector<8x12xf32>
    %85 = arith.mulf %82, %62 : vector<8x12xf32>
    %86 = arith.mulf %81, %83 : vector<8x12xf32>
    %87 = arith.addf %85, %86 : vector<8x12xf32>
    %88 = math.tanh %87 : vector<8x12xf32>
    %89 = arith.mulf %84, %88 : vector<8x12xf32>
    %c16 = arith.constant 16 : index
    %c0_26 = arith.constant 0 : index
    %90 = vector.load %arg1[%c16, %c0_26] : memref<64x12xf32, #tpu.memory_space<vmem>>, vector<8x12xf32>
    %91 = arith.mulf %89, %90 : vector<8x12xf32>
    %c16_27 = arith.constant 16 : index
    %c0_28 = arith.constant 0 : index
    %92 = vector.load %arg15[%c16_27, %c0_28] : memref<64x24xf32, #tpu.memory_space<vmem>>, vector<8x12xf32>
    tpu.vector_store %arg15[%c16_27, %c0_28], %91 {strides = array<i32>} : memref<64x24xf32, #tpu.memory_space<vmem>>, vector<8x12xf32>,
    %c40 = arith.constant 40 : index
    %c12_29 = arith.constant 12 : index
    %93 = vector.load %arg15[%c40, %c12_29] : memref<64x24xf32, #tpu.memory_space<vmem>>, vector<8x12xf32>
    tpu.vector_store %arg15[%c40, %c12_29], %91 {strides = array<i32>} : memref<64x24xf32, #tpu.memory_space<vmem>>, vector<8x12xf32>,
    %94 = vector.extract_strided_slice %14 {offsets = [24, 0], sizes = [8, 48], strides = [1, 1]} : vector<64x48xf32> to vector<8x48xf32>
    %cst_30 = arith.constant dense<0.000000e+00> : vector<8x48xf32>
    %95 = tpu.matmul %89, %17, %cst_30 {dimension_numbers = #tpu.dot_dimension_numbers<[1], [0], [0], [1], [0, 0, 1, 1], [], []>} : vector<8x12xf32>, vector<12x48xf32>, vector<8x48xf32> -> vector<8x48xf32>
    %96 = arith.addf %94, %95 : vector<8x48xf32>
    %97 = vector.broadcast %18 : vector<1x48xf32> to vector<8x48xf32>
    %98 = arith.addf %96, %97 : vector<8x48xf32>
    %99 = vector.broadcast %8 : vector<1x48xf32> to vector<8x48xf32>
    %100 = arith.mulf %99, %98 : vector<8x48xf32>
    %101 = math.tanh %100 : vector<8x48xf32>
    %102 = vector.broadcast %8 : vector<1x48xf32> to vector<8x48xf32>
    %103 = arith.mulf %102, %101 : vector<8x48xf32>
    %104 = vector.broadcast %11 : vector<1x48xf32> to vector<8x48xf32>
    %105 = arith.addf %103, %104 : vector<8x48xf32>
    %106 = vector.extract_strided_slice %105 {offsets = [0, 0], sizes = [8, 12], strides = [1, 1]} : vector<8x48xf32> to vector<8x12xf32>
    %107 = vector.extract_strided_slice %105 {offsets = [0, 12], sizes = [8, 12], strides = [1, 1]} : vector<8x48xf32> to vector<8x12xf32>
    %108 = vector.extract_strided_slice %105 {offsets = [0, 24], sizes = [8, 12], strides = [1, 1]} : vector<8x48xf32> to vector<8x12xf32>
    %109 = vector.extract_strided_slice %105 {offsets = [0, 36], sizes = [8, 12], strides = [1, 1]} : vector<8x48xf32> to vector<8x12xf32>
    %110 = arith.mulf %107, %87 : vector<8x12xf32>
    %111 = arith.mulf %106, %108 : vector<8x12xf32>
    %112 = arith.addf %110, %111 : vector<8x12xf32>
    %113 = math.tanh %112 : vector<8x12xf32>
    %114 = arith.mulf %109, %113 : vector<8x12xf32>
    %c24 = arith.constant 24 : index
    %c0_31 = arith.constant 0 : index
    %115 = vector.load %arg1[%c24, %c0_31] : memref<64x12xf32, #tpu.memory_space<vmem>>, vector<8x12xf32>
    %116 = arith.mulf %114, %115 : vector<8x12xf32>
    %c24_32 = arith.constant 24 : index
    %c0_33 = arith.constant 0 : index
    %117 = vector.load %arg15[%c24_32, %c0_33] : memref<64x24xf32, #tpu.memory_space<vmem>>, vector<8x12xf32>
    tpu.vector_store %arg15[%c24_32, %c0_33], %116 {strides = array<i32>} : memref<64x24xf32, #tpu.memory_space<vmem>>, vector<8x12xf32>,
    %c32 = arith.constant 32 : index
    %c12_34 = arith.constant 12 : index
    %118 = vector.load %arg15[%c32, %c12_34] : memref<64x24xf32, #tpu.memory_space<vmem>>, vector<8x12xf32>
    tpu.vector_store %arg15[%c32, %c12_34], %116 {strides = array<i32>} : memref<64x24xf32, #tpu.memory_space<vmem>>, vector<8x12xf32>,
    %119 = vector.extract_strided_slice %14 {offsets = [32, 0], sizes = [8, 48], strides = [1, 1]} : vector<64x48xf32> to vector<8x48xf32>
    %cst_35 = arith.constant dense<0.000000e+00> : vector<8x48xf32>
    %120 = tpu.matmul %114, %17, %cst_35 {dimension_numbers = #tpu.dot_dimension_numbers<[1], [0], [0], [1], [0, 0, 1, 1], [], []>} : vector<8x12xf32>, vector<12x48xf32>, vector<8x48xf32> -> vector<8x48xf32>
    %121 = arith.addf %119, %120 : vector<8x48xf32>
    %122 = vector.broadcast %18 : vector<1x48xf32> to vector<8x48xf32>
    %123 = arith.addf %121, %122 : vector<8x48xf32>
    %124 = vector.broadcast %8 : vector<1x48xf32> to vector<8x48xf32>
    %125 = arith.mulf %124, %123 : vector<8x48xf32>
    %126 = math.tanh %125 : vector<8x48xf32>
    %127 = vector.broadcast %8 : vector<1x48xf32> to vector<8x48xf32>
    %128 = arith.mulf %127, %126 : vector<8x48xf32>
    %129 = vector.broadcast %11 : vector<1x48xf32> to vector<8x48xf32>
    %130 = arith.addf %128, %129 : vector<8x48xf32>
    %131 = vector.extract_strided_slice %130 {offsets = [0, 0], sizes = [8, 12], strides = [1, 1]} : vector<8x48xf32> to vector<8x12xf32>
    %132 = vector.extract_strided_slice %130 {offsets = [0, 12], sizes = [8, 12], strides = [1, 1]} : vector<8x48xf32> to vector<8x12xf32>
    %133 = vector.extract_strided_slice %130 {offsets = [0, 24], sizes = [8, 12], strides = [1, 1]} : vector<8x48xf32> to vector<8x12xf32>
    %134 = vector.extract_strided_slice %130 {offsets = [0, 36], sizes = [8, 12], strides = [1, 1]} : vector<8x48xf32> to vector<8x12xf32>
    %135 = arith.mulf %132, %112 : vector<8x12xf32>
    %136 = arith.mulf %131, %133 : vector<8x12xf32>
    %137 = arith.addf %135, %136 : vector<8x12xf32>
    %138 = math.tanh %137 : vector<8x12xf32>
    %139 = arith.mulf %134, %138 : vector<8x12xf32>
    %c32_36 = arith.constant 32 : index
    %c0_37 = arith.constant 0 : index
    %140 = vector.load %arg1[%c32_36, %c0_37] : memref<64x12xf32, #tpu.memory_space<vmem>>, vector<8x12xf32>
    %141 = arith.mulf %139, %140 : vector<8x12xf32>
    %c32_38 = arith.constant 32 : index
    %c0_39 = arith.constant 0 : index
    %142 = vector.load %arg15[%c32_38, %c0_39] : memref<64x24xf32, #tpu.memory_space<vmem>>, vector<8x12xf32>
    tpu.vector_store %arg15[%c32_38, %c0_39], %141 {strides = array<i32>} : memref<64x24xf32, #tpu.memory_space<vmem>>, vector<8x12xf32>,
    %c24_40 = arith.constant 24 : index
    %c12_41 = arith.constant 12 : index
    %143 = vector.load %arg15[%c24_40, %c12_41] : memref<64x24xf32, #tpu.memory_space<vmem>>, vector<8x12xf32>
    tpu.vector_store %arg15[%c24_40, %c12_41], %141 {strides = array<i32>} : memref<64x24xf32, #tpu.memory_space<vmem>>, vector<8x12xf32>,
    %144 = vector.extract_strided_slice %14 {offsets = [40, 0], sizes = [8, 48], strides = [1, 1]} : vector<64x48xf32> to vector<8x48xf32>
    %cst_42 = arith.constant dense<0.000000e+00> : vector<8x48xf32>
    %145 = tpu.matmul %139, %17, %cst_42 {dimension_numbers = #tpu.dot_dimension_numbers<[1], [0], [0], [1], [0, 0, 1, 1], [], []>} : vector<8x12xf32>, vector<12x48xf32>, vector<8x48xf32> -> vector<8x48xf32>
    %146 = arith.addf %144, %145 : vector<8x48xf32>
    %147 = vector.broadcast %18 : vector<1x48xf32> to vector<8x48xf32>
    %148 = arith.addf %146, %147 : vector<8x48xf32>
    %149 = vector.broadcast %8 : vector<1x48xf32> to vector<8x48xf32>
    %150 = arith.mulf %149, %148 : vector<8x48xf32>
    %151 = math.tanh %150 : vector<8x48xf32>
    %152 = vector.broadcast %8 : vector<1x48xf32> to vector<8x48xf32>
    %153 = arith.mulf %152, %151 : vector<8x48xf32>
    %154 = vector.broadcast %11 : vector<1x48xf32> to vector<8x48xf32>
    %155 = arith.addf %153, %154 : vector<8x48xf32>
    %156 = vector.extract_strided_slice %155 {offsets = [0, 0], sizes = [8, 12], strides = [1, 1]} : vector<8x48xf32> to vector<8x12xf32>
    %157 = vector.extract_strided_slice %155 {offsets = [0, 12], sizes = [8, 12], strides = [1, 1]} : vector<8x48xf32> to vector<8x12xf32>
    %158 = vector.extract_strided_slice %155 {offsets = [0, 24], sizes = [8, 12], strides = [1, 1]} : vector<8x48xf32> to vector<8x12xf32>
    %159 = vector.extract_strided_slice %155 {offsets = [0, 36], sizes = [8, 12], strides = [1, 1]} : vector<8x48xf32> to vector<8x12xf32>
    %160 = arith.mulf %157, %137 : vector<8x12xf32>
    %161 = arith.mulf %156, %158 : vector<8x12xf32>
    %162 = arith.addf %160, %161 : vector<8x12xf32>
    %163 = math.tanh %162 : vector<8x12xf32>
    %164 = arith.mulf %159, %163 : vector<8x12xf32>
    %c40_43 = arith.constant 40 : index
    %c0_44 = arith.constant 0 : index
    %165 = vector.load %arg1[%c40_43, %c0_44] : memref<64x12xf32, #tpu.memory_space<vmem>>, vector<8x12xf32>
    %166 = arith.mulf %164, %165 : vector<8x12xf32>
    %c40_45 = arith.constant 40 : index
    %c0_46 = arith.constant 0 : index
    %167 = vector.load %arg15[%c40_45, %c0_46] : memref<64x24xf32, #tpu.memory_space<vmem>>, vector<8x12xf32>
    tpu.vector_store %arg15[%c40_45, %c0_46], %166 {strides = array<i32>} : memref<64x24xf32, #tpu.memory_space<vmem>>, vector<8x12xf32>,
    %c16_47 = arith.constant 16 : index
    %c12_48 = arith.constant 12 : index
    %168 = vector.load %arg15[%c16_47, %c12_48] : memref<64x24xf32, #tpu.memory_space<vmem>>, vector<8x12xf32>
    tpu.vector_store %arg15[%c16_47, %c12_48], %166 {strides = array<i32>} : memref<64x24xf32, #tpu.memory_space<vmem>>, vector<8x12xf32>,
    %169 = vector.extract_strided_slice %14 {offsets = [48, 0], sizes = [8, 48], strides = [1, 1]} : vector<64x48xf32> to vector<8x48xf32>
    %cst_49 = arith.constant dense<0.000000e+00> : vector<8x48xf32>
    %170 = tpu.matmul %164, %17, %cst_49 {dimension_numbers = #tpu.dot_dimension_numbers<[1], [0], [0], [1], [0, 0, 1, 1], [], []>} : vector<8x12xf32>, vector<12x48xf32>, vector<8x48xf32> -> vector<8x48xf32>
    %171 = arith.addf %169, %170 : vector<8x48xf32>
    %172 = vector.broadcast %18 : vector<1x48xf32> to vector<8x48xf32>
    %173 = arith.addf %171, %172 : vector<8x48xf32>
    %174 = vector.broadcast %8 : vector<1x48xf32> to vector<8x48xf32>
    %175 = arith.mulf %174, %173 : vector<8x48xf32>
    %176 = math.tanh %175 : vector<8x48xf32>
    %177 = vector.broadcast %8 : vector<1x48xf32> to vector<8x48xf32>
    %178 = arith.mulf %177, %176 : vector<8x48xf32>
    %179 = vector.broadcast %11 : vector<1x48xf32> to vector<8x48xf32>
    %180 = arith.addf %178, %179 : vector<8x48xf32>
    %181 = vector.extract_strided_slice %180 {offsets = [0, 0], sizes = [8, 12], strides = [1, 1]} : vector<8x48xf32> to vector<8x12xf32>
    %182 = vector.extract_strided_slice %180 {offsets = [0, 12], sizes = [8, 12], strides = [1, 1]} : vector<8x48xf32> to vector<8x12xf32>
    %183 = vector.extract_strided_slice %180 {offsets = [0, 24], sizes = [8, 12], strides = [1, 1]} : vector<8x48xf32> to vector<8x12xf32>
    %184 = vector.extract_strided_slice %180 {offsets = [0, 36], sizes = [8, 12], strides = [1, 1]} : vector<8x48xf32> to vector<8x12xf32>
    %185 = arith.mulf %182, %162 : vector<8x12xf32>
    %186 = arith.mulf %181, %183 : vector<8x12xf32>
    %187 = arith.addf %185, %186 : vector<8x12xf32>
    %188 = math.tanh %187 : vector<8x12xf32>
    %189 = arith.mulf %184, %188 : vector<8x12xf32>
    %c48_50 = arith.constant 48 : index
    %c0_51 = arith.constant 0 : index
    %190 = vector.load %arg1[%c48_50, %c0_51] : memref<64x12xf32, #tpu.memory_space<vmem>>, vector<8x12xf32>
    %191 = arith.mulf %189, %190 : vector<8x12xf32>
    %c48_52 = arith.constant 48 : index
    %c0_53 = arith.constant 0 : index
    %192 = vector.load %arg15[%c48_52, %c0_53] : memref<64x24xf32, #tpu.memory_space<vmem>>, vector<8x12xf32>
    tpu.vector_store %arg15[%c48_52, %c0_53], %191 {strides = array<i32>} : memref<64x24xf32, #tpu.memory_space<vmem>>, vector<8x12xf32>,
    %c8_54 = arith.constant 8 : index
    %c12_55 = arith.constant 12 : index
    %193 = vector.load %arg15[%c8_54, %c12_55] : memref<64x24xf32, #tpu.memory_space<vmem>>, vector<8x12xf32>
    tpu.vector_store %arg15[%c8_54, %c12_55], %191 {strides = array<i32>} : memref<64x24xf32, #tpu.memory_space<vmem>>, vector<8x12xf32>,
    %194 = vector.extract_strided_slice %14 {offsets = [56, 0], sizes = [8, 48], strides = [1, 1]} : vector<64x48xf32> to vector<8x48xf32>
    %cst_56 = arith.constant dense<0.000000e+00> : vector<8x48xf32>
    %195 = tpu.matmul %189, %17, %cst_56 {dimension_numbers = #tpu.dot_dimension_numbers<[1], [0], [0], [1], [0, 0, 1, 1], [], []>} : vector<8x12xf32>, vector<12x48xf32>, vector<8x48xf32> -> vector<8x48xf32>
    %196 = arith.addf %194, %195 : vector<8x48xf32>
    %197 = vector.broadcast %18 : vector<1x48xf32> to vector<8x48xf32>
    %198 = arith.addf %196, %197 : vector<8x48xf32>
    %199 = vector.broadcast %8 : vector<1x48xf32> to vector<8x48xf32>
    %200 = arith.mulf %199, %198 : vector<8x48xf32>
    %201 = math.tanh %200 : vector<8x48xf32>
    %202 = vector.broadcast %8 : vector<1x48xf32> to vector<8x48xf32>
    %203 = arith.mulf %202, %201 : vector<8x48xf32>
    %204 = vector.broadcast %11 : vector<1x48xf32> to vector<8x48xf32>
    %205 = arith.addf %203, %204 : vector<8x48xf32>
    %206 = vector.extract_strided_slice %205 {offsets = [0, 0], sizes = [8, 12], strides = [1, 1]} : vector<8x48xf32> to vector<8x12xf32>
    %207 = vector.extract_strided_slice %205 {offsets = [0, 12], sizes = [8, 12], strides = [1, 1]} : vector<8x48xf32> to vector<8x12xf32>
    %208 = vector.extract_strided_slice %205 {offsets = [0, 24], sizes = [8, 12], strides = [1, 1]} : vector<8x48xf32> to vector<8x12xf32>
    %209 = vector.extract_strided_slice %205 {offsets = [0, 36], sizes = [8, 12], strides = [1, 1]} : vector<8x48xf32> to vector<8x12xf32>
    %210 = arith.mulf %207, %187 : vector<8x12xf32>
    %211 = arith.mulf %206, %208 : vector<8x12xf32>
    %212 = arith.addf %210, %211 : vector<8x12xf32>
    %213 = math.tanh %212 : vector<8x12xf32>
    %214 = arith.mulf %209, %213 : vector<8x12xf32>
    %c56_57 = arith.constant 56 : index
    %c0_58 = arith.constant 0 : index
    %215 = vector.load %arg1[%c56_57, %c0_58] : memref<64x12xf32, #tpu.memory_space<vmem>>, vector<8x12xf32>
    %216 = arith.mulf %214, %215 : vector<8x12xf32>
    %c56_59 = arith.constant 56 : index
    %c0_60 = arith.constant 0 : index
    %217 = vector.load %arg15[%c56_59, %c0_60] : memref<64x24xf32, #tpu.memory_space<vmem>>, vector<8x12xf32>
    tpu.vector_store %arg15[%c56_59, %c0_60], %216 {strides = array<i32>} : memref<64x24xf32, #tpu.memory_space<vmem>>, vector<8x12xf32>,
    %c0_61 = arith.constant 0 : index
    %c12_62 = arith.constant 12 : index
    %218 = vector.load %arg15[%c0_61, %c12_62] : memref<64x24xf32, #tpu.memory_space<vmem>>, vector<8x12xf32>
    tpu.vector_store %arg15[%c0_61, %c12_62], %216 {strides = array<i32>} : memref<64x24xf32, #tpu.memory_space<vmem>>, vector<8x12xf32>,
    %c0_63 = arith.constant 0 : index
    %c0_64 = arith.constant 0 : index
    %219 = vector.load %arg15[%c0_63, %c0_64] : memref<64x24xf32, #tpu.memory_space<vmem>>, vector<64x24xf32>
    %c0_65 = arith.constant 0 : index
    %c0_66 = arith.constant 0 : index
    %220 = vector.load %arg9[%c0_65, %c0_66] : memref<24x48xf32, #tpu.memory_space<vmem>>, vector<24x48xf32>
    %cst_67 = arith.constant dense<0.000000e+00> : vector<64x48xf32>
    %221 = tpu.matmul %219, %220, %cst_67 {dimension_numbers = #tpu.dot_dimension_numbers<[1], [0], [0], [1], [0, 0, 1, 1], [], []>} : vector<64x24xf32>, vector<24x48xf32>, vector<64x48xf32> -> vector<64x48xf32>
    %c0_68 = arith.constant 0 : index
    %c0_69 = arith.constant 0 : index
    %222 = vector.load %arg4[%c0_68, %c0_69] : memref<8x12xf32, #tpu.memory_space<vmem>>, vector<8x12xf32>
    %c0_70 = arith.constant 0 : index
    %c0_71 = arith.constant 0 : index
    %223 = vector.load %arg5[%c0_70, %c0_71] : memref<8x12xf32, #tpu.memory_space<vmem>>, vector<8x12xf32>
    %c0_72 = arith.constant 0 : index
    %c0_73 = arith.constant 0 : index
    %224 = vector.load %arg10[%c0_72, %c0_73] : memref<12x48xf32, #tpu.memory_space<vmem>>, vector<12x48xf32>
    %c0_74 = arith.constant 0 : index
    %c0_75 = arith.constant 0 : index
    %225 = vector.load %arg11[%c0_74, %c0_75] : memref<1x48xf32, #tpu.memory_space<vmem>>, vector<1x48xf32>
    %226 = vector.extract_strided_slice %221 {offsets = [0, 0], sizes = [8, 48], strides = [1, 1]} : vector<64x48xf32> to vector<8x48xf32>
    %cst_76 = arith.constant dense<0.000000e+00> : vector<8x48xf32>
    %227 = tpu.matmul %222, %224, %cst_76 {dimension_numbers = #tpu.dot_dimension_numbers<[1], [0], [0], [1], [0, 0, 1, 1], [], []>} : vector<8x12xf32>, vector<12x48xf32>, vector<8x48xf32> -> vector<8x48xf32>
    %228 = arith.addf %226, %227 : vector<8x48xf32>
    %229 = vector.broadcast %225 : vector<1x48xf32> to vector<8x48xf32>
    %230 = arith.addf %228, %229 : vector<8x48xf32>
    %231 = vector.broadcast %8 : vector<1x48xf32> to vector<8x48xf32>
    %232 = arith.mulf %231, %230 : vector<8x48xf32>
    %233 = math.tanh %232 : vector<8x48xf32>
    %234 = vector.broadcast %8 : vector<1x48xf32> to vector<8x48xf32>
    %235 = arith.mulf %234, %233 : vector<8x48xf32>
    %236 = vector.broadcast %11 : vector<1x48xf32> to vector<8x48xf32>
    %237 = arith.addf %235, %236 : vector<8x48xf32>
    %238 = vector.extract_strided_slice %237 {offsets = [0, 0], sizes = [8, 12], strides = [1, 1]} : vector<8x48xf32> to vector<8x12xf32>
    %239 = vector.extract_strided_slice %237 {offsets = [0, 12], sizes = [8, 12], strides = [1, 1]} : vector<8x48xf32> to vector<8x12xf32>
    %240 = vector.extract_strided_slice %237 {offsets = [0, 24], sizes = [8, 12], strides = [1, 1]} : vector<8x48xf32> to vector<8x12xf32>
    %241 = vector.extract_strided_slice %237 {offsets = [0, 36], sizes = [8, 12], strides = [1, 1]} : vector<8x48xf32> to vector<8x12xf32>
    %242 = arith.mulf %239, %223 : vector<8x12xf32>
    %243 = arith.mulf %238, %240 : vector<8x12xf32>
    %244 = arith.addf %242, %243 : vector<8x12xf32>
    %245 = math.tanh %244 : vector<8x12xf32>
    %246 = arith.mulf %241, %245 : vector<8x12xf32>
    %247 = vector.extract_strided_slice %221 {offsets = [8, 0], sizes = [8, 48], strides = [1, 1]} : vector<64x48xf32> to vector<8x48xf32>
    %cst_77 = arith.constant dense<0.000000e+00> : vector<8x48xf32>
    %248 = tpu.matmul %246, %224, %cst_77 {dimension_numbers = #tpu.dot_dimension_numbers<[1], [0], [0], [1], [0, 0, 1, 1], [], []>} : vector<8x12xf32>, vector<12x48xf32>, vector<8x48xf32> -> vector<8x48xf32>
    %249 = arith.addf %247, %248 : vector<8x48xf32>
    %250 = vector.broadcast %225 : vector<1x48xf32> to vector<8x48xf32>
    %251 = arith.addf %249, %250 : vector<8x48xf32>
    %252 = vector.broadcast %8 : vector<1x48xf32> to vector<8x48xf32>
    %253 = arith.mulf %252, %251 : vector<8x48xf32>
    %254 = math.tanh %253 : vector<8x48xf32>
    %255 = vector.broadcast %8 : vector<1x48xf32> to vector<8x48xf32>
    %256 = arith.mulf %255, %254 : vector<8x48xf32>
    %257 = vector.broadcast %11 : vector<1x48xf32> to vector<8x48xf32>
    %258 = arith.addf %256, %257 : vector<8x48xf32>
    %259 = vector.extract_strided_slice %258 {offsets = [0, 0], sizes = [8, 12], strides = [1, 1]} : vector<8x48xf32> to vector<8x12xf32>
    %260 = vector.extract_strided_slice %258 {offsets = [0, 12], sizes = [8, 12], strides = [1, 1]} : vector<8x48xf32> to vector<8x12xf32>
    %261 = vector.extract_strided_slice %258 {offsets = [0, 24], sizes = [8, 12], strides = [1, 1]} : vector<8x48xf32> to vector<8x12xf32>
    %262 = vector.extract_strided_slice %258 {offsets = [0, 36], sizes = [8, 12], strides = [1, 1]} : vector<8x48xf32> to vector<8x12xf32>
    %263 = arith.mulf %260, %244 : vector<8x12xf32>
    %264 = arith.mulf %259, %261 : vector<8x12xf32>
    %265 = arith.addf %263, %264 : vector<8x12xf32>
    %266 = math.tanh %265 : vector<8x12xf32>
    %267 = arith.mulf %262, %266 : vector<8x12xf32>
    %268 = vector.extract_strided_slice %221 {offsets = [16, 0], sizes = [8, 48], strides = [1, 1]} : vector<64x48xf32> to vector<8x48xf32>
    %cst_78 = arith.constant dense<0.000000e+00> : vector<8x48xf32>
    %269 = tpu.matmul %267, %224, %cst_78 {dimension_numbers = #tpu.dot_dimension_numbers<[1], [0], [0], [1], [0, 0, 1, 1], [], []>} : vector<8x12xf32>, vector<12x48xf32>, vector<8x48xf32> -> vector<8x48xf32>
    %270 = arith.addf %268, %269 : vector<8x48xf32>
    %271 = vector.broadcast %225 : vector<1x48xf32> to vector<8x48xf32>
    %272 = arith.addf %270, %271 : vector<8x48xf32>
    %273 = vector.broadcast %8 : vector<1x48xf32> to vector<8x48xf32>
    %274 = arith.mulf %273, %272 : vector<8x48xf32>
    %275 = math.tanh %274 : vector<8x48xf32>
    %276 = vector.broadcast %8 : vector<1x48xf32> to vector<8x48xf32>
    %277 = arith.mulf %276, %275 : vector<8x48xf32>
    %278 = vector.broadcast %11 : vector<1x48xf32> to vector<8x48xf32>
    %279 = arith.addf %277, %278 : vector<8x48xf32>
    %280 = vector.extract_strided_slice %279 {offsets = [0, 0], sizes = [8, 12], strides = [1, 1]} : vector<8x48xf32> to vector<8x12xf32>
    %281 = vector.extract_strided_slice %279 {offsets = [0, 12], sizes = [8, 12], strides = [1, 1]} : vector<8x48xf32> to vector<8x12xf32>
    %282 = vector.extract_strided_slice %279 {offsets = [0, 24], sizes = [8, 12], strides = [1, 1]} : vector<8x48xf32> to vector<8x12xf32>
    %283 = vector.extract_strided_slice %279 {offsets = [0, 36], sizes = [8, 12], strides = [1, 1]} : vector<8x48xf32> to vector<8x12xf32>
    %284 = arith.mulf %281, %265 : vector<8x12xf32>
    %285 = arith.mulf %280, %282 : vector<8x12xf32>
    %286 = arith.addf %284, %285 : vector<8x12xf32>
    %287 = math.tanh %286 : vector<8x12xf32>
    %288 = arith.mulf %283, %287 : vector<8x12xf32>
    %289 = vector.extract_strided_slice %221 {offsets = [24, 0], sizes = [8, 48], strides = [1, 1]} : vector<64x48xf32> to vector<8x48xf32>
    %cst_79 = arith.constant dense<0.000000e+00> : vector<8x48xf32>
    %290 = tpu.matmul %288, %224, %cst_79 {dimension_numbers = #tpu.dot_dimension_numbers<[1], [0], [0], [1], [0, 0, 1, 1], [], []>} : vector<8x12xf32>, vector<12x48xf32>, vector<8x48xf32> -> vector<8x48xf32>
    %291 = arith.addf %289, %290 : vector<8x48xf32>
    %292 = vector.broadcast %225 : vector<1x48xf32> to vector<8x48xf32>
    %293 = arith.addf %291, %292 : vector<8x48xf32>
    %294 = vector.broadcast %8 : vector<1x48xf32> to vector<8x48xf32>
    %295 = arith.mulf %294, %293 : vector<8x48xf32>
    %296 = math.tanh %295 : vector<8x48xf32>
    %297 = vector.broadcast %8 : vector<1x48xf32> to vector<8x48xf32>
    %298 = arith.mulf %297, %296 : vector<8x48xf32>
    %299 = vector.broadcast %11 : vector<1x48xf32> to vector<8x48xf32>
    %300 = arith.addf %298, %299 : vector<8x48xf32>
    %301 = vector.extract_strided_slice %300 {offsets = [0, 0], sizes = [8, 12], strides = [1, 1]} : vector<8x48xf32> to vector<8x12xf32>
    %302 = vector.extract_strided_slice %300 {offsets = [0, 12], sizes = [8, 12], strides = [1, 1]} : vector<8x48xf32> to vector<8x12xf32>
    %303 = vector.extract_strided_slice %300 {offsets = [0, 24], sizes = [8, 12], strides = [1, 1]} : vector<8x48xf32> to vector<8x12xf32>
    %304 = vector.extract_strided_slice %300 {offsets = [0, 36], sizes = [8, 12], strides = [1, 1]} : vector<8x48xf32> to vector<8x12xf32>
    %305 = arith.mulf %302, %286 : vector<8x12xf32>
    %306 = arith.mulf %301, %303 : vector<8x12xf32>
    %307 = arith.addf %305, %306 : vector<8x12xf32>
    %308 = math.tanh %307 : vector<8x12xf32>
    %309 = arith.mulf %304, %308 : vector<8x12xf32>
    %310 = vector.extract_strided_slice %221 {offsets = [32, 0], sizes = [8, 48], strides = [1, 1]} : vector<64x48xf32> to vector<8x48xf32>
    %cst_80 = arith.constant dense<0.000000e+00> : vector<8x48xf32>
    %311 = tpu.matmul %309, %224, %cst_80 {dimension_numbers = #tpu.dot_dimension_numbers<[1], [0], [0], [1], [0, 0, 1, 1], [], []>} : vector<8x12xf32>, vector<12x48xf32>, vector<8x48xf32> -> vector<8x48xf32>
    %312 = arith.addf %310, %311 : vector<8x48xf32>
    %313 = vector.broadcast %225 : vector<1x48xf32> to vector<8x48xf32>
    %314 = arith.addf %312, %313 : vector<8x48xf32>
    %315 = vector.broadcast %8 : vector<1x48xf32> to vector<8x48xf32>
    %316 = arith.mulf %315, %314 : vector<8x48xf32>
    %317 = math.tanh %316 : vector<8x48xf32>
    %318 = vector.broadcast %8 : vector<1x48xf32> to vector<8x48xf32>
    %319 = arith.mulf %318, %317 : vector<8x48xf32>
    %320 = vector.broadcast %11 : vector<1x48xf32> to vector<8x48xf32>
    %321 = arith.addf %319, %320 : vector<8x48xf32>
    %322 = vector.extract_strided_slice %321 {offsets = [0, 0], sizes = [8, 12], strides = [1, 1]} : vector<8x48xf32> to vector<8x12xf32>
    %323 = vector.extract_strided_slice %321 {offsets = [0, 12], sizes = [8, 12], strides = [1, 1]} : vector<8x48xf32> to vector<8x12xf32>
    %324 = vector.extract_strided_slice %321 {offsets = [0, 24], sizes = [8, 12], strides = [1, 1]} : vector<8x48xf32> to vector<8x12xf32>
    %325 = vector.extract_strided_slice %321 {offsets = [0, 36], sizes = [8, 12], strides = [1, 1]} : vector<8x48xf32> to vector<8x12xf32>
    %326 = arith.mulf %323, %307 : vector<8x12xf32>
    %327 = arith.mulf %322, %324 : vector<8x12xf32>
    %328 = arith.addf %326, %327 : vector<8x12xf32>
    %329 = math.tanh %328 : vector<8x12xf32>
    %330 = arith.mulf %325, %329 : vector<8x12xf32>
    %331 = vector.extract_strided_slice %221 {offsets = [40, 0], sizes = [8, 48], strides = [1, 1]} : vector<64x48xf32> to vector<8x48xf32>
    %cst_81 = arith.constant dense<0.000000e+00> : vector<8x48xf32>
    %332 = tpu.matmul %330, %224, %cst_81 {dimension_numbers = #tpu.dot_dimension_numbers<[1], [0], [0], [1], [0, 0, 1, 1], [], []>} : vector<8x12xf32>, vector<12x48xf32>, vector<8x48xf32> -> vector<8x48xf32>
    %333 = arith.addf %331, %332 : vector<8x48xf32>
    %334 = vector.broadcast %225 : vector<1x48xf32> to vector<8x48xf32>
    %335 = arith.addf %333, %334 : vector<8x48xf32>
    %336 = vector.broadcast %8 : vector<1x48xf32> to vector<8x48xf32>
    %337 = arith.mulf %336, %335 : vector<8x48xf32>
    %338 = math.tanh %337 : vector<8x48xf32>
    %339 = vector.broadcast %8 : vector<1x48xf32> to vector<8x48xf32>
    %340 = arith.mulf %339, %338 : vector<8x48xf32>
    %341 = vector.broadcast %11 : vector<1x48xf32> to vector<8x48xf32>
    %342 = arith.addf %340, %341 : vector<8x48xf32>
    %343 = vector.extract_strided_slice %342 {offsets = [0, 0], sizes = [8, 12], strides = [1, 1]} : vector<8x48xf32> to vector<8x12xf32>
    %344 = vector.extract_strided_slice %342 {offsets = [0, 12], sizes = [8, 12], strides = [1, 1]} : vector<8x48xf32> to vector<8x12xf32>
    %345 = vector.extract_strided_slice %342 {offsets = [0, 24], sizes = [8, 12], strides = [1, 1]} : vector<8x48xf32> to vector<8x12xf32>
    %346 = vector.extract_strided_slice %342 {offsets = [0, 36], sizes = [8, 12], strides = [1, 1]} : vector<8x48xf32> to vector<8x12xf32>
    %347 = arith.mulf %344, %328 : vector<8x12xf32>
    %348 = arith.mulf %343, %345 : vector<8x12xf32>
    %349 = arith.addf %347, %348 : vector<8x12xf32>
    %350 = math.tanh %349 : vector<8x12xf32>
    %351 = arith.mulf %346, %350 : vector<8x12xf32>
    %352 = vector.extract_strided_slice %221 {offsets = [48, 0], sizes = [8, 48], strides = [1, 1]} : vector<64x48xf32> to vector<8x48xf32>
    %cst_82 = arith.constant dense<0.000000e+00> : vector<8x48xf32>
    %353 = tpu.matmul %351, %224, %cst_82 {dimension_numbers = #tpu.dot_dimension_numbers<[1], [0], [0], [1], [0, 0, 1, 1], [], []>} : vector<8x12xf32>, vector<12x48xf32>, vector<8x48xf32> -> vector<8x48xf32>
    %354 = arith.addf %352, %353 : vector<8x48xf32>
    %355 = vector.broadcast %225 : vector<1x48xf32> to vector<8x48xf32>
    %356 = arith.addf %354, %355 : vector<8x48xf32>
    %357 = vector.broadcast %8 : vector<1x48xf32> to vector<8x48xf32>
    %358 = arith.mulf %357, %356 : vector<8x48xf32>
    %359 = math.tanh %358 : vector<8x48xf32>
    %360 = vector.broadcast %8 : vector<1x48xf32> to vector<8x48xf32>
    %361 = arith.mulf %360, %359 : vector<8x48xf32>
    %362 = vector.broadcast %11 : vector<1x48xf32> to vector<8x48xf32>
    %363 = arith.addf %361, %362 : vector<8x48xf32>
    %364 = vector.extract_strided_slice %363 {offsets = [0, 0], sizes = [8, 12], strides = [1, 1]} : vector<8x48xf32> to vector<8x12xf32>
    %365 = vector.extract_strided_slice %363 {offsets = [0, 12], sizes = [8, 12], strides = [1, 1]} : vector<8x48xf32> to vector<8x12xf32>
    %366 = vector.extract_strided_slice %363 {offsets = [0, 24], sizes = [8, 12], strides = [1, 1]} : vector<8x48xf32> to vector<8x12xf32>
    %367 = vector.extract_strided_slice %363 {offsets = [0, 36], sizes = [8, 12], strides = [1, 1]} : vector<8x48xf32> to vector<8x12xf32>
    %368 = arith.mulf %365, %349 : vector<8x12xf32>
    %369 = arith.mulf %364, %366 : vector<8x12xf32>
    %370 = arith.addf %368, %369 : vector<8x12xf32>
    %371 = math.tanh %370 : vector<8x12xf32>
    %372 = arith.mulf %367, %371 : vector<8x12xf32>
    %373 = vector.extract_strided_slice %221 {offsets = [56, 0], sizes = [8, 48], strides = [1, 1]} : vector<64x48xf32> to vector<8x48xf32>
    %cst_83 = arith.constant dense<0.000000e+00> : vector<8x48xf32>
    %374 = tpu.matmul %372, %224, %cst_83 {dimension_numbers = #tpu.dot_dimension_numbers<[1], [0], [0], [1], [0, 0, 1, 1], [], []>} : vector<8x12xf32>, vector<12x48xf32>, vector<8x48xf32> -> vector<8x48xf32>
    %375 = arith.addf %373, %374 : vector<8x48xf32>
    %376 = vector.broadcast %225 : vector<1x48xf32> to vector<8x48xf32>
    %377 = arith.addf %375, %376 : vector<8x48xf32>
    %378 = vector.broadcast %8 : vector<1x48xf32> to vector<8x48xf32>
    %379 = arith.mulf %378, %377 : vector<8x48xf32>
    %380 = math.tanh %379 : vector<8x48xf32>
    %381 = vector.broadcast %8 : vector<1x48xf32> to vector<8x48xf32>
    %382 = arith.mulf %381, %380 : vector<8x48xf32>
    %383 = vector.broadcast %11 : vector<1x48xf32> to vector<8x48xf32>
    %384 = arith.addf %382, %383 : vector<8x48xf32>
    %385 = vector.extract_strided_slice %384 {offsets = [0, 0], sizes = [8, 12], strides = [1, 1]} : vector<8x48xf32> to vector<8x12xf32>
    %386 = vector.extract_strided_slice %384 {offsets = [0, 12], sizes = [8, 12], strides = [1, 1]} : vector<8x48xf32> to vector<8x12xf32>
    %387 = vector.extract_strided_slice %384 {offsets = [0, 24], sizes = [8, 12], strides = [1, 1]} : vector<8x48xf32> to vector<8x12xf32>
    %388 = vector.extract_strided_slice %384 {offsets = [0, 36], sizes = [8, 12], strides = [1, 1]} : vector<8x48xf32> to vector<8x12xf32>
    %389 = arith.mulf %386, %370 : vector<8x12xf32>
    %390 = arith.mulf %385, %387 : vector<8x12xf32>
    %391 = arith.addf %389, %390 : vector<8x12xf32>
    %392 = math.tanh %391 : vector<8x12xf32>
    %393 = arith.mulf %388, %392 : vector<8x12xf32>
    %394 = vector.extract_strided_slice %393 {offsets = [0, 0], sizes = [8, 6], strides = [1, 1]} : vector<8x12xf32> to vector<8x6xf32>
    %395 = vector.extract_strided_slice %246 {offsets = [0, 6], sizes = [8, 6], strides = [1, 1]} : vector<8x12xf32> to vector<8x6xf32>
    %396 = tpu.concatenate %394, %395 in 1 : vector<8x6xf32>, vector<8x6xf32> -> vector<8x12xf32>
    %cst_84 = arith.constant 0.000000e+00 : f32
    %397 = vector.broadcast %cst_84 : f32 to vector<8x12xf32>
    %398 = arith.maximumf %396, %397 : vector<8x12xf32>
    %c0_85 = arith.constant 0 : index
    %c0_86 = arith.constant 0 : index
    %399 = vector.load %arg12[%c0_85, %c0_86] : memref<12x6xf32, #tpu.memory_space<vmem>>, vector<12x6xf32>
    %cst_87 = arith.constant dense<0.000000e+00> : vector<8x6xf32>
    %400 = tpu.matmul %398, %399, %cst_87 {dimension_numbers = #tpu.dot_dimension_numbers<[1], [0], [0], [1], [0, 0, 1, 1], [], []>} : vector<8x12xf32>, vector<12x6xf32>, vector<8x6xf32> -> vector<8x6xf32>
    %c0_88 = arith.constant 0 : index
    %c0_89 = arith.constant 0 : index
    %401 = vector.load %arg13[%c0_88, %c0_89] : memref<1x6xf32, #tpu.memory_space<vmem>>, vector<1x6xf32>
    %402 = vector.broadcast %401 : vector<1x6xf32> to vector<8x6xf32>
    %403 = arith.addf %400, %402 : vector<8x6xf32>
    %c0_90 = arith.constant 0 : index
    %c0_91 = arith.constant 0 : index
    %404 = vector.load %arg14[%c0_90, %c0_91] : memref<8x6xf32, #tpu.memory_space<vmem>>, vector<8x6xf32>
    tpu.vector_store %arg14[%c0_90, %c0_91], %403 {strides = array<i32>} : memref<8x6xf32, #tpu.memory_space<vmem>>, vector<8x6xf32>,
    return
  }
}

</mosaic_0001>

<bundles_post_ra>
// kernel: aux_model_forward.3
= control target key start
LH: loop header
LB: loop body
LE: loop exit
PB: predicated region body
PF: predicated region fallthrough
CT: control target
= control target key end

     0   :  { %vm89_vm0 = vcmask 1043456   ;;  %vm64_vm1 = vcmask 97280   ;;  %vm2589_vm2 = vmmov 1   ;;  %v2590_v3 = vmov 0.0|0.0   ;;  %s2594_s26 = smov 104   ;;  %s2595_s28 = smov 12   ;;  %s3165_s6 = inlined_call_operand.vmem [shape: f32[12,48], index: 6, kind: input, shape index: {}]   ;;  %s3166_s7 = inlined_call_operand.vmem [shape: f32[12,48], index: 7, kind: input, shape index: {}]   ;;  %s3167_s0 = inlined_call_operand.vmem [shape: f32[64,12], index: 0, kind: input, shape index: {}]   ;;  %s3168_s2 = inlined_call_operand.vmem [shape: f32[8,12], index: 2, kind: input, shape index: {}]   ;;  %s3169_s8 = inlined_call_operand.vmem [shape: f32[1,48], index: 8, kind: input, shape index: {}]   ;;  %s3170_s3 = inlined_call_operand.vmem [shape: f32[8,12], index: 3, kind: input, shape index: {}]   ;;  %s3171_s1 = inlined_call_operand.vmem [shape: f32[64,12], index: 1, kind: input, shape index: {}]   ;;  %s3172_s9 = inlined_call_operand.vmem [shape: f32[24,48], index: 9, kind: input, shape index: {}]   ;;  %s3173_s10 = inlined_call_operand.vmem [shape: f32[12,48], index: 10, kind: input, shape index: {}]   ;;  %s3174_s4 = inlined_call_operand.vmem [shape: f32[8,12], index: 4, kind: input, shape index: {}]   ;;  %s3175_s5 = inlined_call_operand.vmem [shape: f32[8,12], index: 5, kind: input, shape index: {}]   ;;  %s3176_s11 = inlined_call_operand.vmem [shape: f32[1,48], index: 11, kind: input, shape index: {}]   ;;  %s3177_s12 = inlined_call_operand.vmem [shape: f32[12,6], index: 12, kind: input, shape index: {}]   ;;  %s3178_s13 = inlined_call_operand.vmem [shape: f32[1,6], index: 13, kind: input, shape index: {}]   ;;  %s3179_s14 = inlined_call_operand.vmem [shape: f32[8,6], index: 14, kind: output, shape index: {}]  }
   0x1   :  { %v62_v0 = vld [vmem:[%s3165_s6] sm:$0xff]  ;;  %v63_v1 = vld [vmem:[%s3165_s6 + $0x8] sm:$0xf]  ;;  %vm2680_vm3 = vmpackc.low %vm89_vm0, %vm2589_vm2  ;;  %2443 = vmatprep.subr.bf16.mxu1 %v2590_v3  ;;  %vm2591_vm4 = vmmov 0   ;;  %v2592_v8 = vmov 0.0   ;;  %v47_v12 = vlaneseq  ;;  %v2593_v20 = vmov 0.5  }
   0x2   :  { %v2437_v4 = vpack.c.bf16 %v63_v1, %v62_v0  ;;  %v200_v5 = vld [vmem:[%s3166_s7] sm:$0xff]  ;;  %v201_v6 = vld [vmem:[%s3166_s7 + $0x8] sm:$0xf]  ;;  %2304 = vmatprep.mubr.msk.f32.mxu1 %vm2591_vm4, %v2592_v8  ;;  %s2596_s29 = smov 24   ;;  %v56_v52 = vld [vmem:[%s3167_s0 + $0x10] sm:$0xff]  ;;  %vm326_vm8 = vcmask 195680  }
   0x3   :  { %v54_v7 = vld [vmem:[%s3167_s0] sm:$0xff]  ;;  %v2696_v9 = vpack.c.bf16 %v201_v6, %v200_v5  ;;  %v55_v10 = vld [vmem:[%s3167_s0 + $0x8] sm:$0xff]  ;;  %v48_v13 = vand.u32 127, %v47_v12  ;;  %v57_v53 = vld [vmem:[%s3167_s0 + $0x18] sm:$0xff]  ;;  %vm1130_vm9 = vcmask 195584   ;;  %vm2065_vm10 = vcmask 48128  }
   0x4   :  { %2288 = vmatprep.mubr.msk.f32.mxu0 %vm64_vm1, %v54_v7  ;;  %2439 = vmatprep.subr.msk.bf16.mxu0 %vm2680_vm3, %v2437_v4  ;;  %v198_v11 = vld [vmem:[%s3168_s2] sm:$0xff]  ;;  %s2598_s2 = smov 36  }
   0x5   :  { %2442 = vmatpush3.bf16.msk.msra.mxu0 %vm2680_vm3, %v2437_v4  ;;  %2446 = vmatpush3.bf16.msk.msra.mxu1 %vm2680_vm3, %v2696_v9  ;;  %vm49_vm5 = vcmp.ge.s32.totalorder %v48_v13, 24  ;;  %vm50_vm6 = vcmp.lt.s32.totalorder %v48_v13, 36  ;;  %v2729_v17 = vld [vmem:[%s3169_s8] ss:$0 sm:$0xff] }
   0x6   :  { %2447 = vmatprep.subr.bf16.mxu1 %v2590_v3  ;;  %2459 = vmatprep.subr.bf16.mxu0 %v2590_v3  ;;  %vm51_vm7 = vmand %vm49_vm5, %vm50_vm6  ;;  %v199_v28 = vld [vmem:[%s3170_s3] sm:$0xff]  ;;  %s2597_s3 = smov 92  }
   0x7   :  { %v2731_v21 = vsel %vm51_vm7, 1.0, %v2593_v20  ;;  %v2735_v25 = vsel %vm51_vm7, 0.0, %v2593_v20 }
   0x8   :  { %2289 = vmatmul.mubr.msk.f32.vlgmr.msra.gmra.mrb[0].mxu0 %vm64_vm1, %v55_v10  ;;  %2305 = vmatmul.mubr.msk.f32.vlgmr.msra.gmra.mrb[0].mxu1 %vm64_vm1, %v198_v11 }
   0x9   :  { %2450 = vmatpush3.bf16.msk.msra.mxu1 %vm2680_vm3, %v2696_v9  ;;  %2311 = vmatprep.mubr.msk.f32.mxu1 %vm2591_vm4, %v2592_v8 }
   0xa   :  { %2451 = vmatprep.subr.bf16.mxu1 %v2590_v3  ;;  %2462 = vmatpush3.bf16.msk.msra.mxu0 %vm2680_vm3, %v2696_v9 }
   0xb   :  { %2467 = vmatprep.subr.bf16.mxu0 %v2590_v3  ;;  %2291 = vmatprep.mubr.msk.f32.mxu0 %vm64_vm1, %v56_v52 }
   0xc   :  { %2292 = vmatmul.mubr.msk.f32.gmra.mrb[2].mxu0 %vm64_vm1, %v57_v53 }
  0xdb   :  { %v2290_v14 = vpop.f32.mrb[0].mxu0  ;;  %v275_v15 = vpop.f32.mrb[0].mxu1 }
  0xdc   :  { %v159_v16 = vpop.f32.mrb[1].mxu0  ;;  %v2306_v18 = vpop.f32.mrb[1].mxu1 }
  0xdd   :  { %v279_v19 = vadd.f32 %v275_v15, %v159_v16 }
  0xdf   :  { %v286_v22 = vadd.f32 %v2729_v17, %v279_v19  ;;  %v2293_v57 = vpop.f32.mrb[2].mxu0 }
  0xe0   :  { %v169_v58 = vpop.f32.mrb[3].mxu0 }
  0xe1   :  { %v287_v23 = vmul.f32 %v286_v22, %v2731_v21 }
  0xe3   :  { %2525 = vtanh.f32 %v287_v23 }
  0xed   :  { %v2526_v24 = vpop.eup %2525 }
  0xee   :  { %v289_v26 = vmul.f32 %v2526_v24, %v2731_v21 }
  0xf0   :  { %v290_v27 = vadd.f32 %v289_v26, %v2735_v25 }
  0xf2   :  { %297 = vrot.lane.b32.xlu0 %v290_v27, %s2594_s26 }
  0xf6   :  { %292 = vrot.lane.b32.xlu0 %v199_v28, %s2595_s28 }
 0x164   :  { %v298_v29 = vpop.permute.xlu0 %297 }
 0x165   :  { %v300_v30 = vmul.f32 %v298_v29, %v290_v27 }
 0x167   :  { %302 = vrot.lane.b32.xlu1 %v300_v30, %s2595_s28 }
 0x168   :  { %v293_v31 = vpop.permute.xlu0 %292 }
 0x169   :  { %v295_v32 = vmul.f32 %v293_v31, %v290_v27 }
 0x1d9   :  { %v303_v33 = vpop.permute.xlu1 %302 }
 0x1da   :  { %v305_v34 = vadd.f32 %v303_v33, %v295_v32  ;;  %v58_v33 = vld [vmem:[%s3167_s0 + $0x20] sm:$0xff] }
 0x1db   :  { %2294 = vmatprep.mubr.msk.f32.mxu0 %vm64_vm1, %v58_v33 }
 0x1dc   :  { %2527 = vtanh.f32 %v305_v34 }
 0x1e6   :  { %v2528_v35 = vpop.eup %2527 }
 0x1e7   :  { %308 = vrot.lane.b32.xlu1 %v2528_v35, %s2596_s29  ;;  %v60_v35 = vld [vmem:[%s3167_s0 + $0x30] sm:$0xff] }
 0x259   :  { %v309_v36 = vpop.permute.xlu1 %308 }
 0x25a   :  { %v2746_v37 = vmul.f32 %v309_v36, %v290_v27  ;;  %v61_v36 = vld [vmem:[%s3167_s0 + $0x38] sm:$0xff] }
 0x25c   :  { %329 = vrot.lane.b32.xlu0 %v2746_v37, %s2597_s3 }
 0x2ce   :  { %v330_v38 = vpop.permute.xlu0 %329 }
 0x2cf   :  { %2312 = vmatmul.mubr.msk.f32.vlgmr.msra.gmra.mrb[2].mxu1 %vm64_vm1, %v330_v38 }
 0x2d0   :  { %2454 = vmatpush3.bf16.msk.msra.mxu1 %vm2680_vm3, %v2696_v9  ;;  %2318 = vmatprep.mubr.msk.f32.mxu1 %vm2591_vm4, %v2592_v8 }
 0x2d1   :  { %2455 = vmatprep.subr.bf16.mxu1 %v2590_v3 }
 0x3a2   :  { %v399_v39 = vpop.f32.mrb[2].mxu1 }
 0x3a3   :  { %v403_v40 = vadd.f32 %v2290_v14, %v399_v39  ;;  %v2313_v41 = vpop.f32.mrb[3].mxu1 }
 0x3a5   :  { %v404_v42 = vadd.f32 %v2729_v17, %v403_v40 }
 0x3a7   :  { %v405_v43 = vmul.f32 %v404_v42, %v2731_v21 }
 0x3a9   :  { %2529 = vtanh.f32 %v405_v43 }
 0x3b3   :  { %v2530_v44 = vpop.eup %2529 }
 0x3b4   :  { %v407_v45 = vmul.f32 %v2530_v44, %v2731_v21 }
 0x3b6   :  { %v408_v46 = vadd.f32 %v407_v45, %v2735_v25 }
 0x3b8   :  { %411 = vrot.lane.b32.xlu1 %v408_v46, %s2594_s26  ;;  %v409_v49 = vmul.f32 %v408_v46, %v305_v34  ;;  %v59_v34 = vld [vmem:[%s3167_s0 + $0x28] sm:$0xff] }
 0x3b9   :  { %2295 = vmatmul.mubr.msk.f32.gmra.mrb[4].mxu0 %vm64_vm1, %v59_v34 }
 0x3ba   :  { %2297 = vmatprep.mubr.msk.f32.mxu0 %vm64_vm1, %v60_v35 }
 0x3bd   :  { %2298 = vmatmul.mubr.msk.f32.gmra.mrb[6].mxu0 %vm64_vm1, %v61_v36 }
 0x3be   :  { %2332 = vmatprep.mubr.msk.f32.mxu0 %vm2591_vm4, %v2592_v8 }
 0x42a   :  { %v412_v47 = vpop.permute.xlu1 %411 }
 0x42b   :  { %v414_v48 = vmul.f32 %v412_v47, %v408_v46 }
 0x42d   :  { %416 = vrot.lane.b32.xlu0 %v414_v48, %s2595_s28 }
 0x48c   :  { %v2296_v41 = vpop.f32.mrb[4].mxu0 }
 0x48d   :  { %v179_v42 = vpop.f32.mrb[5].mxu0 }
 0x490   :  { %v2830_v43 = vpop.f32.mrb[6].mxu0 }
 0x491   :  { %v189_v44 = vpop.f32.mrb[7].mxu0 }
 0x49f   :  { %v417_v50 = vpop.permute.xlu0 %416 }
 0x4a0   :  { %v419_v51 = vadd.f32 %v417_v50, %v409_v49 }
 0x4a2   :  { %2531 = vtanh.f32 %v419_v51 }
 0x4ac   :  { %v2532_v54 = vpop.eup %2531 }
 0x4ad   :  { %422 = vrot.lane.b32.xlu1 %v2532_v54, %s2596_s29 }
 0x51f   :  { %v423_v55 = vpop.permute.xlu1 %422 }
 0x520   :  { %v2772_v56 = vmul.f32 %v423_v55, %v408_v46 }
 0x522   :  { %442 = vrot.lane.b32.xlu0 %v2772_v56, %s2597_s3 }
 0x594   :  { %v443_v59 = vpop.permute.xlu0 %442 }
 0x595   :  { %2319 = vmatmul.mubr.msk.f32.vlgmr.msra.gmra.mrb[4].mxu1 %vm64_vm1, %v443_v59 }
 0x596   :  { %2458 = vmatpush3.bf16.msk.msra.mxu1 %vm2680_vm3, %v2696_v9  ;;  %2325 = vmatprep.mubr.msk.f32.mxu1 %vm2591_vm4, %v2592_v8 }
 0x597   :  { %2463 = vmatprep.subr.bf16.mxu1 %v2590_v3 }
 0x668   :  { %v512_v60 = vpop.f32.mrb[4].mxu1 }
 0x669   :  { %v516_v61 = vadd.f32 %v512_v60, %v169_v58  ;;  %v2320_v62 = vpop.f32.mrb[5].mxu1 }
 0x66b   :  { %v517_v63 = vadd.f32 %v2729_v17, %v516_v61 }
 0x66d   :  { %v518_v0 = vmul.f32 %v517_v63, %v2731_v21 }
 0x66f   :  { %2533 = vtanh.f32 %v518_v0 }
 0x679   :  { %v2534_v1 = vpop.eup %2533 }
 0x67a   :  { %v520_v4 = vmul.f32 %v2534_v1, %v2731_v21 }
 0x67c   :  { %v521_v5 = vadd.f32 %v520_v4, %v2735_v25 }
 0x67e   :  { %524 = vrot.lane.b32.xlu1 %v521_v5, %s2594_s26  ;;  %v522_v10 = vmul.f32 %v521_v5, %v419_v51 }
 0x6f0   :  { %v525_v6 = vpop.permute.xlu1 %524 }
 0x6f1   :  { %v527_v7 = vmul.f32 %v525_v6, %v521_v5 }
 0x6f3   :  { %529 = vrot.lane.b32.xlu0 %v527_v7, %s2595_s28 }
 0x765   :  { %v530_v11 = vpop.permute.xlu0 %529 }
 0x766   :  { %v532_v12 = vadd.f32 %v530_v11, %v522_v10 }
 0x768   :  { %2535 = vtanh.f32 %v532_v12 }
 0x772   :  { %v2536_v13 = vpop.eup %2535 }
 0x773   :  { %535 = vrot.lane.b32.xlu1 %v2536_v13, %s2596_s29 }
 0x7e5   :  { %v536_v14 = vpop.permute.xlu1 %535 }
 0x7e6   :  { %v2790_v15 = vmul.f32 %v536_v14, %v521_v5 }
 0x7e8   :  { %555 = vrot.lane.b32.xlu0 %v2790_v15, %s2597_s3 }
 0x85a   :  { %v556_v16 = vpop.permute.xlu0 %555 }
 0x85b   :  { %2326 = vmatmul.mubr.msk.f32.vlgmr.msra.gmra.mrb[6].mxu1 %vm64_vm1, %v556_v16 }
 0x85c   :  { %2466 = vmatpush3.bf16.msk.msra.mxu1 %vm2680_vm3, %v2696_v9  ;;  %2339 = vmatprep.mubr.msk.f32.mxu1 %vm2591_vm4, %v2592_v8 }
 0x85d   :  { %2471 = vmatprep.subr.bf16.mxu1 %v2590_v3 }
 0x92e   :  { %v625_v18 = vpop.f32.mrb[6].mxu1 }
 0x92f   :  { %v629_v19 = vadd.f32 %v2293_v57, %v625_v18  ;;  %v2327_v20 = vpop.f32.mrb[7].mxu1 }
 0x931   :  { %v630_v22 = vadd.f32 %v2729_v17, %v629_v19 }
 0x933   :  { %v631_v23 = vmul.f32 %v630_v22, %v2731_v21 }
 0x935   :  { %2537 = vtanh.f32 %v631_v23 }
 0x93f   :  { %v2538_v24 = vpop.eup %2537 }
 0x940   :  { %v633_v26 = vmul.f32 %v2538_v24, %v2731_v21 }
 0x942   :  { %v634_v27 = vadd.f32 %v633_v26, %v2735_v25 }
 0x944   :  { %637 = vrot.lane.b32.xlu1 %v634_v27, %s2594_s26  ;;  %v635_v30 = vmul.f32 %v634_v27, %v532_v12 }
 0x9b6   :  { %v638_v28 = vpop.permute.xlu1 %637 }
 0x9b7   :  { %v640_v29 = vmul.f32 %v638_v28, %v634_v27 }
 0x9b9   :  { %642 = vrot.lane.b32.xlu0 %v640_v29, %s2595_s28 }
 0xa2b   :  { %v643_v31 = vpop.permute.xlu0 %642 }
 0xa2c   :  { %v645_v32 = vadd.f32 %v643_v31, %v635_v30 }
 0xa2e   :  { %2539 = vtanh.f32 %v645_v32 }
 0xa38   :  { %v2540_v38 = vpop.eup %2539 }
 0xa39   :  { %648 = vrot.lane.b32.xlu1 %v2540_v38, %s2596_s29 }
 0xaab   :  { %v649_v39 = vpop.permute.xlu1 %648 }
 0xaac   :  { %v2826_v40 = vmul.f32 %v649_v39, %v634_v27 }
 0xaae   :  { %668 = vrot.lane.b32.xlu0 %v2826_v40, %s2597_s3 }
 0xb20   :  { %v669_v45 = vpop.permute.xlu0 %668 }
 0xb21   :  { %2333 = vmatmul.mubr.msk.f32.vlgmr.msra.gmra.mrb[8].mxu0 %vm64_vm1, %v669_v45 }
 0xb22   :  { %2470 = vmatpush3.bf16.msk.msra.mxu0 %vm2680_vm3, %v2696_v9  ;;  %2346 = vmatprep.mubr.msk.f32.mxu0 %vm2591_vm4, %v2592_v8 }
 0xbf4   :  { %v738_v46 = vpop.f32.mrb[8].mxu0 }
 0xbf5   :  { %v742_v47 = vadd.f32 %v738_v46, %v179_v42  ;;  %v2334_v48 = vpop.f32.mrb[9].mxu0 }
 0xbf7   :  { %v743_v49 = vadd.f32 %v2729_v17, %v742_v47 }
 0xbf9   :  { %v744_v50 = vmul.f32 %v743_v49, %v2731_v21 }
 0xbfb   :  { %2541 = vtanh.f32 %v744_v50 }
 0xc05   :  { %v2542_v51 = vpop.eup %2541 }
 0xc06   :  { %v746_v52 = vmul.f32 %v2542_v51, %v2731_v21 }
 0xc08   :  { %v747_v53 = vadd.f32 %v746_v52, %v2735_v25  ;;  %v426_v52 = vld [vmem:[%s3171_s1 + $0x8] sm:$0xff] }
 0xc0a   :  { %750 = vrot.lane.b32.xlu1 %v747_v53, %s2594_s26  ;;  %v748_v57 = vmul.f32 %v747_v53, %v645_v32 }
 0xc7c   :  { %v751_v54 = vpop.permute.xlu1 %750 }
 0xc7d   :  { %v753_v55 = vmul.f32 %v751_v54, %v747_v53  ;;  %v1104_v54 = vld [vmem:[%s3171_s1 + $0x38] sm:$0xff] }
 0xc7f   :  { %755 = vrot.lane.b32.xlu0 %v753_v55, %s2595_s28 }
 0xcf1   :  { %v756_v58 = vpop.permute.xlu0 %755 }
 0xcf2   :  { %v758_v59 = vadd.f32 %v756_v58, %v748_v57 }
 0xcf4   :  { %2543 = vtanh.f32 %v758_v59 }
 0xcfe   :  { %v2544_v60 = vpop.eup %2543 }
 0xcff   :  { %761 = vrot.lane.b32.xlu1 %v2544_v60, %s2596_s29 }
 0xd71   :  { %v762_v61 = vpop.permute.xlu1 %761 }
 0xd72   :  { %v2845_v62 = vmul.f32 %v762_v61, %v747_v53 }
 0xd74   :  { %781 = vrot.lane.b32.xlu0 %v2845_v62, %s2597_s3 }
 0xde6   :  { %v782_v63 = vpop.permute.xlu0 %781 }
 0xde7   :  { %2340 = vmatmul.mubr.msk.f32.vlgmr.msra.gmra.mrb[8].mxu1 %vm64_vm1, %v782_v63  ;;  %v991_v63 = vld [vmem:[%s3171_s1 + $0x30] sm:$0xff] }
 0xde8   :  { %2474 = vmatpush3.bf16.msk.msra.mxu1 %vm2680_vm3, %v2696_v9  ;;  %2353 = vmatprep.mubr.msk.f32.mxu1 %vm2591_vm4, %v2592_v8 }
 0xde9   :  { %2479 = vmatprep.subr.bf16.mxu1 %v2590_v3 }
 0xeba   :  { %v851_v0 = vpop.f32.mrb[8].mxu1 }
 0xebb   :  { %v855_v1 = vadd.f32 %v2296_v41, %v851_v0  ;;  %v2341_v4 = vpop.f32.mrb[9].mxu1 }
 0xebd   :  { %v856_v5 = vadd.f32 %v2729_v17, %v855_v1 }
 0xebf   :  { %v857_v6 = vmul.f32 %v856_v5, %v2731_v21  ;;  %v1127_v5 = vld [vmem:[%s3172_s9] sm:$0xff] }
 0xec1   :  { %2545 = vtanh.f32 %v857_v6  ;;  %v1128_v6 = vld [vmem:[%s3172_s9 + $0x8] sm:$0xff] }
 0xecb   :  { %v2546_v7 = vpop.eup %2545 }
 0xecc   :  { %v859_v10 = vmul.f32 %v2546_v7, %v2731_v21  ;;  %v2475_v7 = vpack.c.bf16 %v1128_v6, %v1127_v5  ;;  %v765_v6 = vld [vmem:[%s3171_s1 + $0x20] sm:$0xff] }
 0xece   :  { %v860_v11 = vadd.f32 %v859_v10, %v2735_v25  ;;  %v1262_v10 = vld [vmem:[%s3173_s10] sm:$0xff]  ;;  %2476 = vmatprep.subr.bf16.mxu0 %v2475_v7 }
 0xed0   :  { %863 = vrot.lane.b32.xlu1 %v860_v11, %s2594_s26  ;;  %v861_v13 = vmul.f32 %v860_v11, %v758_v59 }
 0xf42   :  { %v864_v9 = vpop.permute.xlu1 %863 }
 0xf43   :  { %v866_v12 = vmul.f32 %v864_v9, %v860_v11 }
 0xf45   :  { %868 = vrot.lane.b32.xlu0 %v866_v12, %s2595_s28 }
 0xfb7   :  { %v869_v14 = vpop.permute.xlu0 %868 }
 0xfb8   :  { %v871_v16 = vadd.f32 %v869_v14, %v861_v13  ;;  %v1260_v14 = vld [vmem:[%s3174_s4] sm:$0xff] }
 0xfba   :  { %2547 = vtanh.f32 %v871_v16 }
 0xfc4   :  { %v2548_v18 = vpop.eup %2547 }
 0xfc5   :  { %874 = vrot.lane.b32.xlu1 %v2548_v18, %s2596_s29 }
0x1037   :  { %v875_v19 = vpop.permute.xlu1 %874 }
0x1038   :  { %v2863_v20 = vmul.f32 %v875_v19, %v860_v11  ;;  %v1263_v11 = vld [vmem:[%s3173_s10 + $0x8] sm:$0xf] }
0x1039   :  { %v2932_v9 = vpack.c.bf16 %v1263_v11, %v1262_v10 }
0x103a   :  { %894 = vrot.lane.b32.xlu0 %v2863_v20, %s2597_s3 }
0x10ac   :  { %v895_v22 = vpop.permute.xlu0 %894 }
0x10ad   :  { %2347 = vmatmul.mubr.msk.f32.vlgmr.msra.gmra.mrb[10].mxu0 %vm64_vm1, %v895_v22 }
0x10ae   :  { %2478 = vmatpush3.bf16.msra.mxu0 %v2475_v7 }
0x1180   :  { %v964_v23 = vpop.f32.mrb[10].mxu0 }
0x1181   :  { %v968_v24 = vadd.f32 %v964_v23, %v189_v44  ;;  %v2348_v26 = vpop.f32.mrb[11].mxu0  ;;  %v1261_v23 = vld [vmem:[%s3175_s5] sm:$0xff] }
0x1183   :  { %v969_v27 = vadd.f32 %v2729_v17, %v968_v24 }
0x1185   :  { %v970_v28 = vmul.f32 %v969_v27, %v2731_v21 }
0x1187   :  { %2549 = vtanh.f32 %v970_v28 }
0x1191   :  { %v2550_v29 = vpop.eup %2549 }
0x1192   :  { %v972_v30 = vmul.f32 %v2550_v29, %v2731_v21 }
0x1194   :  { %v973_v31 = vadd.f32 %v972_v30, %v2735_v25 }
0x1196   :  { %976 = vrot.lane.b32.xlu1 %v973_v31, %s2594_s26  ;;  %v974_v34 = vmul.f32 %v973_v31, %v871_v16 }
0x1208   :  { %v977_v32 = vpop.permute.xlu1 %976 }
0x1209   :  { %v979_v33 = vmul.f32 %v977_v32, %v973_v31 }
0x120b   :  { %981 = vrot.lane.b32.xlu0 %v979_v33, %s2595_s28  ;;  %v2974_v33 = vld [vmem:[%s3176_s11] ss:$0 sm:$0xff] }
0x127d   :  { %v982_v35 = vpop.permute.xlu0 %981 }
0x127e   :  { %v984_v36 = vadd.f32 %v982_v35, %v974_v34 }
0x1280   :  { %2551 = vtanh.f32 %v984_v36 }
0x128a   :  { %v2552_v38 = vpop.eup %2551 }
0x128b   :  { %987 = vrot.lane.b32.xlu1 %v2552_v38, %s2596_s29 }
0x12fd   :  { %v988_v39 = vpop.permute.xlu1 %987 }
0x12fe   :  { %v2875_v41 = vmul.f32 %v988_v39, %v973_v31 }
0x1300   :  { %1007 = vrot.lane.b32.xlu0 %v2875_v41, %s2597_s3 }
0x1372   :  { %v1008_v42 = vpop.permute.xlu0 %1007 }
0x1373   :  { %2354 = vmatmul.mubr.msk.f32.vlgmr.msra.gmra.mrb[10].mxu1 %vm64_vm1, %v1008_v42 }
0x1374   :  { %2378 = vmatprep.mubr.msk.f32.mxu1 %vm2591_vm4, %v2592_v8  ;;  %2482 = vmatpush3.bf16.msk.msra.mxu1 %vm2680_vm3, %v2932_v9 }
0x1375   :  { %2483 = vmatprep.subr.bf16.mxu1 %v2590_v3 }
0x1377   :  { %2379 = vmatmul.mubr.msk.f32.vlgmr.msra.gmra.mrb[12].mxu1 %vm64_vm1, %v1260_v14 }
0x1378   :  { %2486 = vmatpush3.bf16.msk.msra.mxu1 %vm2680_vm3, %v2932_v9  ;;  %2385 = vmatprep.mubr.msk.f32.mxu1 %vm2591_vm4, %v2592_v8 }
0x1379   :  { %2487 = vmatprep.subr.bf16.mxu1 %v2590_v3 }
0x1446   :  { %v1077_v44 = vpop.f32.mrb[10].mxu1 }
0x1447   :  { %v1081_v45 = vadd.f32 %v2830_v43, %v1077_v44  ;;  %v2355_v46 = vpop.f32.mrb[11].mxu1 }
0x1449   :  { %v1082_v47 = vadd.f32 %v2729_v17, %v1081_v45  ;;  %v312_v17 = vld [vmem:[%s3171_s1] sm:$0xff] }
0x144a   :  { %v1337_v29 = vpop.f32.mrb[12].mxu1 }
0x144b   :  { %v1083_v48 = vmul.f32 %v1082_v47, %v2731_v21  ;;  %v2380_v30 = vpop.f32.mrb[13].mxu1 }
0x144d   :  { %2553 = vtanh.f32 %v1083_v48 }
0x1457   :  { %v2554_v49 = vpop.eup %2553 }
0x1458   :  { %v1085_v50 = vmul.f32 %v2554_v49, %v2731_v21 }
0x145a   :  { %v1086_v51 = vadd.f32 %v1085_v50, %v2735_v25 }
0x145c   :  { %1089 = vrot.lane.b32.xlu1 %v1086_v51, %s2594_s26  ;;  %v1087_v55 = vmul.f32 %v1086_v51, %v984_v36 }
0x1460   :  { %428 = vrot.lane.b32.xlu1 %v426_v52, %s2598_s2 }
0x14ce   :  { %v1090_v43 = vpop.permute.xlu1 %1089 }
0x14cf   :  { %v1092_v53 = vmul.f32 %v1090_v43, %v1086_v51 }
0x14d1   :  { %1094 = vrot.lane.b32.xlu0 %v1092_v53, %s2595_s28 }
0x14d2   :  { %v429_v0 = vpop.permute.xlu1 %428 }
0x14d3   :  { %v2912_v1 = vmul.f32 %v429_v0, %v2772_v56  ;;  %v1129_v56 = vld [vmem:[%s3172_s9 + $0x10] sm:$0xff] }
0x14d4   :  { %2360 = vmatprep.subr.mxu0 %v1129_v56 }
0x14d5   :  { %314 = vrot.lane.b32.xlu0 %v312_v17, %s2598_s2  ;;  %2361 = vmatpush3.msra.mxu0 %v1129_v56 }
0x14d6   :  { %2499 = vmatprep.subr.bf16.mxu0 %v2590_v3 }
0x14d9   :  { %1106 = vrot.lane.b32.xlu0 %v1104_v54, %s2598_s2 }
0x1543   :  { %v1095_v57 = vpop.permute.xlu0 %1094 }
0x1544   :  { %v1097_v58 = vadd.f32 %v1095_v57, %v1087_v55 }
0x1546   :  { %2555 = vtanh.f32 %v1097_v58 }
0x1547   :  { %v315_v59 = vpop.permute.xlu0 %314 }
0x1548   :  { %v2902_v60 = vmul.f32 %v315_v59, %v2746_v37 }
0x154a   :  { %319 = vrot.lane.b32.xlu0 %v2902_v60, %s2597_s3 }
0x154b   :  { %v1107_v37 = vpop.permute.xlu0 %1106 }
0x1550   :  { %v2556_v61 = vpop.eup %2555 }
0x1551   :  { %1100 = vrot.lane.b32.xlu1 %v2556_v61, %s2596_s29  ;;  %v539_v61 = vld [vmem:[%s3171_s1 + $0x10] sm:$0xff] }
0x1555   :  { %993 = vrot.lane.b32.xlu1 %v991_v63, %s2598_s2  ;;  %v878_v63 = vld [vmem:[%s3171_s1 + $0x28] sm:$0xff] }
0x1559   :  { %433 = vrot.lane.b32.xlu1 %v2912_v1, %s2597_s3 }
0x15bc   :  { %v320_v4 = vpop.permute.xlu0 %319 }
0x15bd   :  { %322 = vst.msk [vmem:[#allocation2] sm:$0xff] %vm64_vm1, %v320_v4  ;;  %v652_v4 = vld [vmem:[%s3171_s1 + $0x18] sm:$0xff] }
0x15c3   :  { %v1101_v12 = vpop.permute.xlu1 %1100 }
0x15c4   :  { %v1103_v13 = vmul.f32 %v1101_v12, %v1086_v51 }
0x15c6   :  { %v2943_v16 = vmul.f32 %v1107_v37, %v1103_v13 }
0x15c7   :  { %v994_v18 = vpop.permute.xlu1 %993 }
0x15c8   :  { %v2952_v19 = vmul.f32 %v994_v18, %v2875_v41  ;;  %1115 = vrot.lane.b32.xlu0 %v2943_v16, %s2594_s26 }
0x15ca   :  { %1002 = vrot.lane.b32.xlu1 %v2952_v19, %s2594_s26 }
0x15cb   :  { %v434_v22 = vpop.permute.xlu1 %433 }
0x15cc   :  { %436 = vst.msk [vmem:[#allocation2 + $0x8] sm:$0xff] %vm64_vm1, %v434_v22 }
0x15ce   :  { %1354 = vrot.lane.b32.xlu1 %v1261_v23, %s2595_s28 }
0x163a   :  { %v1116_v24 = vpop.permute.xlu0 %1115 }
0x163b   :  { %1118 = vst.msk [vmem:[#allocation2] sm:$0xff] %vm326_vm8, %v1116_v24 }
0x163c   :  { %v1003_v26 = vpop.permute.xlu1 %1002 }
0x163d   :  { %1005 = vst.msk [vmem:[#allocation2 + $0x8] sm:$0xff] %vm326_vm8, %v1003_v26 }
0x1640   :  { %v1355_v45 = vpop.permute.xlu1 %1354 }
0x1642   :  { %v1119_v27 = vld [vmem:[#allocation2] sm:$0xff] }
0x1643   :  { %2362 = vmatprep.mubr.msk.f32.mxu0 %vm1130_vm9, %v1119_v27 }
0x1644   :  { %v1120_v28 = vld [vmem:[#allocation2 + $0x8] sm:$0xff] }
0x1645   :  { %2363 = vmatmul.mubr.msk.f32.vlgmr.msra.gmra.mrb[12].mxu0 %vm1130_vm9, %v1120_v28 }
0x1646   :  { %2502 = vmatpush3.bf16.msk.msra.mxu0 %vm2680_vm3, %v2932_v9 }
0x1647   :  { %2507 = vmatprep.subr.bf16.mxu0 %v2590_v3 }
0x1718   :  { %v2364_v31 = vpop.f32.mrb[12].mxu0 }
0x1719   :  { %v1221_v32 = vpop.f32.mrb[13].mxu0 }
0x171a   :  { %v1341_v34 = vadd.f32 %v1337_v29, %v1221_v32 }
0x171c   :  { %v1348_v35 = vadd.f32 %v2974_v33, %v1341_v34 }
0x171e   :  { %v1349_v36 = vmul.f32 %v1348_v35, %v2731_v21 }
0x1720   :  { %2557 = vtanh.f32 %v1349_v36 }
0x172a   :  { %v2558_v38 = vpop.eup %2557 }
0x172b   :  { %v1351_v39 = vmul.f32 %v2558_v38, %v2731_v21 }
0x172d   :  { %v1352_v41 = vadd.f32 %v1351_v39, %v2735_v25 }
0x172f   :  { %1359 = vrot.lane.b32.xlu0 %v1352_v41, %s2594_s26  ;;  %v1357_v46 = vmul.f32 %v1355_v45, %v1352_v41 }
0x17a1   :  { %v1360_v42 = vpop.permute.xlu0 %1359 }
0x17a2   :  { %v1362_v44 = vmul.f32 %v1360_v42, %v1352_v41 }
0x17a4   :  { %1364 = vrot.lane.b32.xlu0 %v1362_v44, %s2595_s28 }
0x1816   :  { %v1365_v47 = vpop.permute.xlu0 %1364 }
0x1817   :  { %v1367_v48 = vadd.f32 %v1365_v47, %v1357_v46 }
0x1819   :  { %2559 = vtanh.f32 %v1367_v48 }
0x1823   :  { %v2560_v49 = vpop.eup %2559 }
0x1824   :  { %1370 = vrot.lane.b32.xlu1 %v2560_v49, %s2596_s29 }
0x1896   :  { %v1371_v50 = vpop.permute.xlu1 %1370 }
0x1897   :  { %v1373_v51 = vmul.f32 %v1371_v50, %v1352_v41 }
0x1899   :  { %1375 = vrot.lane.b32.xlu0 %v1373_v51, %s2597_s3 }
0x190b   :  { %v2984_v52 = vpop.permute.xlu0 %1375 }
0x190c   :  { %2386 = vmatmul.mubr.msk.f32.vlgmr.msra.gmra.mrb[14].mxu1 %vm64_vm1, %v2984_v52 }
0x190d   :  { %2490 = vmatpush3.bf16.msk.msra.mxu1 %vm2680_vm3, %v2932_v9  ;;  %2392 = vmatprep.mubr.msk.f32.mxu1 %vm2591_vm4, %v2592_v8 }
0x190e   :  { %2491 = vmatprep.subr.bf16.mxu1 %v2590_v3 }
0x19df   :  { %v1445_v43 = vpop.f32.mrb[14].mxu1 }
0x19e0   :  { %v1449_v53 = vadd.f32 %v2364_v31, %v1445_v43  ;;  %v2387_v17 = vpop.f32.mrb[15].mxu1 }
0x19e2   :  { %v1450_v54 = vadd.f32 %v2974_v33, %v1449_v53 }
0x19e4   :  { %v1451_v55 = vmul.f32 %v1450_v54, %v2731_v21 }
0x19e6   :  { %2561 = vtanh.f32 %v1451_v55 }
0x19f0   :  { %v2562_v57 = vpop.eup %2561 }
0x19f1   :  { %v1453_v58 = vmul.f32 %v2562_v57, %v2731_v21 }
0x19f3   :  { %v1454_v59 = vadd.f32 %v1453_v58, %v2735_v25 }
0x19f5   :  { %1457 = vrot.lane.b32.xlu1 %v1454_v59, %s2594_s26  ;;  %v1455_v11 = vmul.f32 %v1454_v59, %v1367_v48 }
0x19f9   :  { %541 = vrot.lane.b32.xlu1 %v539_v61, %s2598_s2 }
0x19fd   :  { %880 = vrot.lane.b32.xlu1 %v878_v63, %s2598_s2 }
0x1a67   :  { %v1458_v0 = vpop.permute.xlu1 %1457 }
0x1a68   :  { %v1460_v37 = vmul.f32 %v1458_v0, %v1454_v59 }
0x1a6a   :  { %1462 = vrot.lane.b32.xlu0 %v1460_v37, %s2595_s28 }
0x1a6b   :  { %v542_v5 = vpop.permute.xlu1 %541 }
0x1a6c   :  { %v3017_v7 = vmul.f32 %v542_v5, %v2790_v15 }
0x1a6e   :  { %654 = vrot.lane.b32.xlu0 %v652_v4, %s2598_s2 }
0x1a6f   :  { %v881_v56 = vpop.permute.xlu1 %880 }
0x1a70   :  { %v3022_v10 = vmul.f32 %v881_v56, %v2863_v20 }
0x1a72   :  { %767 = vrot.lane.b32.xlu0 %v765_v6, %s2598_s2 }
0x1a76   :  { %546 = vrot.lane.b32.xlu0 %v3017_v7, %s2597_s3 }
0x1a7a   :  { %889 = vrot.lane.b32.xlu0 %v3022_v10, %s2594_s26 }
0x1adc   :  { %v1463_v12 = vpop.permute.xlu0 %1462 }
0x1add   :  { %v1465_v13 = vadd.f32 %v1463_v12, %v1455_v11 }
0x1adf   :  { %2563 = vtanh.f32 %v1465_v13 }
0x1ae0   :  { %v655_v14 = vpop.permute.xlu0 %654 }
0x1ae1   :  { %v3029_v15 = vmul.f32 %v655_v14, %v2826_v40 }
0x1ae4   :  { %v768_v18 = vpop.permute.xlu0 %767 }
0x1ae5   :  { %v770_v24 = vmul.f32 %v768_v18, %v2845_v62 }
0x1ae8   :  { %v547_v22 = vpop.permute.xlu0 %546 }
0x1ae9   :  { %v2564_v23 = vpop.eup %2563  ;;  %549 = vst.msk [vmem:[#allocation2 + $0x10] sm:$0xff] %vm64_vm1, %v547_v22 }
0x1aea   :  { %1468 = vrot.lane.b32.xlu1 %v2564_v23, %s2596_s29 }
0x1aec   :  { %v890_v20 = vpop.permute.xlu0 %889 }
0x1aed   :  { %892 = vst.msk [vmem:[#allocation2 + $0x10] sm:$0xff] %vm326_vm8, %v890_v20 }
0x1aee   :  { %659 = vrot.lane.b32.xlu1 %v3029_v15, %s2597_s3 }
0x1af2   :  { %776 = vrot.lane.b32.xlu1 %v770_v24, %s2594_s26 }
0x1af4   :  { %v1121_v26 = vld [vmem:[#allocation2 + $0x10] sm:$0xff] }
0x1af5   :  { %2365 = vmatprep.mubr.msk.f32.mxu0 %vm1130_vm9, %v1121_v26 }
0x1b5c   :  { %v1469_v27 = vpop.permute.xlu1 %1468 }
0x1b5d   :  { %v1471_v28 = vmul.f32 %v1469_v27, %v1454_v59 }
0x1b5f   :  { %1473 = vrot.lane.b32.xlu0 %v1471_v28, %s2597_s3 }
0x1b60   :  { %v660_v29 = vpop.permute.xlu1 %659 }
0x1b61   :  { %662 = vst.msk [vmem:[#allocation2 + $0x18] sm:$0xff] %vm64_vm1, %v660_v29 }
0x1b64   :  { %v777_v40 = vpop.permute.xlu1 %776 }
0x1b65   :  { %779 = vst.msk [vmem:[#allocation2 + $0x18] sm:$0xff] %vm326_vm8, %v777_v40 }
0x1b6c   :  { %v1122_v30 = vld [vmem:[#allocation2 + $0x18] sm:$0xff] }
0x1b6d   :  { %2366 = vmatmul.mubr.msk.f32.gmra.mrb[14].mxu0 %vm1130_vm9, %v1122_v30 }
0x1bd1   :  { %v1474_v31 = vpop.permute.xlu0 %1473 }
0x1bd2   :  { %2393 = vmatmul.mubr.msk.f32.vlgmr.msra.gmra.mrb[16].mxu1 %vm64_vm1, %v1474_v31 }
0x1bd3   :  { %2494 = vmatpush3.bf16.msk.msra.mxu1 %vm2680_vm3, %v2932_v9  ;;  %2399 = vmatprep.mubr.msk.f32.mxu1 %vm2591_vm4, %v2592_v8 }
0x1bd4   :  { %2495 = vmatprep.subr.bf16.mxu1 %v2590_v3 }
0x1c40   :  { %v2367_v62 = vpop.f32.mrb[14].mxu0 }
0x1c41   :  { %v1231_v32 = vpop.f32.mrb[15].mxu0 }
0x1ca5   :  { %v1543_v34 = vpop.f32.mrb[16].mxu1 }
0x1ca6   :  { %v1547_v35 = vadd.f32 %v1543_v34, %v1231_v32  ;;  %v2394_v36 = vpop.f32.mrb[17].mxu1 }
0x1ca8   :  { %v1548_v38 = vadd.f32 %v2974_v33, %v1547_v35 }
0x1caa   :  { %v1549_v39 = vmul.f32 %v1548_v38, %v2731_v21 }
0x1cac   :  { %2565 = vtanh.f32 %v1549_v39 }
0x1cb6   :  { %v2566_v41 = vpop.eup %2565 }
0x1cb7   :  { %v1551_v42 = vmul.f32 %v2566_v41, %v2731_v21 }
0x1cb9   :  { %v1552_v44 = vadd.f32 %v1551_v42, %v2735_v25 }
0x1cbb   :  { %1555 = vrot.lane.b32.xlu1 %v1552_v44, %s2594_s26  ;;  %v1553_v47 = vmul.f32 %v1552_v44, %v1465_v13 }
0x1d2d   :  { %v1556_v45 = vpop.permute.xlu1 %1555 }
0x1d2e   :  { %v1558_v46 = vmul.f32 %v1556_v45, %v1552_v44 }
0x1d30   :  { %1560 = vrot.lane.b32.xlu0 %v1558_v46, %s2595_s28 }
0x1da2   :  { %v1561_v48 = vpop.permute.xlu0 %1560 }
0x1da3   :  { %v1563_v49 = vadd.f32 %v1561_v48, %v1553_v47 }
0x1da5   :  { %2567 = vtanh.f32 %v1563_v49 }
0x1daf   :  { %v2568_v50 = vpop.eup %2567 }
0x1db0   :  { %1566 = vrot.lane.b32.xlu1 %v2568_v50, %s2596_s29 }
0x1e22   :  { %v1567_v51 = vpop.permute.xlu1 %1566 }
0x1e23   :  { %v1569_v43 = vmul.f32 %v1567_v51, %v1552_v44 }
0x1e25   :  { %1571 = vrot.lane.b32.xlu0 %v1569_v43, %s2597_s3 }
0x1e97   :  { %v1572_v53 = vpop.permute.xlu0 %1571 }
0x1e98   :  { %2400 = vmatmul.mubr.msk.f32.vlgmr.msra.gmra.mrb[18].mxu1 %vm64_vm1, %v1572_v53 }
0x1e99   :  { %2498 = vmatpush3.bf16.msk.msra.mxu1 %vm2680_vm3, %v2932_v9  ;;  %2406 = vmatprep.mubr.msk.f32.mxu1 %vm2591_vm4, %v2592_v8 }
0x1e9a   :  { %2503 = vmatprep.subr.bf16.mxu1 %v2590_v3 }
0x1f6b   :  { %v1641_v17 = vpop.f32.mrb[18].mxu1 }
0x1f6c   :  { %v1645_v54 = vadd.f32 %v2367_v62, %v1641_v17  ;;  %v2401_v55 = vpop.f32.mrb[19].mxu1 }
0x1f6e   :  { %v1646_v57 = vadd.f32 %v2974_v33, %v1645_v54 }
0x1f70   :  { %v1647_v58 = vmul.f32 %v1646_v57, %v2731_v21 }
0x1f72   :  { %2569 = vtanh.f32 %v1647_v58 }
0x1f7c   :  { %v2570_v59 = vpop.eup %2569 }
0x1f7d   :  { %v1649_v61 = vmul.f32 %v2570_v59, %v2731_v21 }
0x1f7f   :  { %v1650_v63 = vadd.f32 %v1649_v61, %v2735_v25 }
0x1f81   :  { %1653 = vrot.lane.b32.xlu1 %v1650_v63, %s2594_s26  ;;  %v1651_v4 = vmul.f32 %v1650_v63, %v1563_v49 }
0x1ff3   :  { %v1654_v0 = vpop.permute.xlu1 %1653 }
0x1ff4   :  { %v1656_v37 = vmul.f32 %v1654_v0, %v1650_v63 }
0x1ff6   :  { %1658 = vrot.lane.b32.xlu0 %v1656_v37, %s2595_s28 }
0x1ffa   :  { %663 = vrot.lane.b32.xlu0 %v3029_v15, %s2594_s26 }
0x1ffe   :  { %772 = vrot.lane.b32.xlu0 %v770_v24, %s2597_s3 }
0x2068   :  { %v1659_v5 = vpop.permute.xlu0 %1658 }
0x2069   :  { %v1661_v6 = vadd.f32 %v1659_v5, %v1651_v4 }
0x206b   :  { %2571 = vtanh.f32 %v1661_v6 }
0x206c   :  { %v664_v56 = vpop.permute.xlu0 %663 }
0x206d   :  { %666 = vst.msk [vmem:[#allocation2 + $0x20] sm:$0xff] %vm326_vm8, %v664_v56 }
0x2070   :  { %v773_v11 = vpop.permute.xlu0 %772 }
0x2071   :  { %775 = vst.msk [vmem:[#allocation2 + $0x20] sm:$0xff] %vm64_vm1, %v773_v11 }
0x2075   :  { %v2572_v12 = vpop.eup %2571 }
0x2076   :  { %1664 = vrot.lane.b32.xlu1 %v2572_v12, %s2596_s29 }
0x2078   :  { %v1123_v13 = vld [vmem:[#allocation2 + $0x20] sm:$0xff] }
0x2079   :  { %2368 = vmatprep.mubr.msk.f32.mxu0 %vm1130_vm9, %v1123_v13 }
0x207a   :  { %550 = vrot.lane.b32.xlu1 %v3017_v7, %s2594_s26 }
0x207e   :  { %885 = vrot.lane.b32.xlu1 %v3022_v10, %s2597_s3 }
0x20e8   :  { %v1665_v14 = vpop.permute.xlu1 %1664 }
0x20e9   :  { %v1667_v18 = vmul.f32 %v1665_v14, %v1650_v63 }
0x20eb   :  { %1669 = vrot.lane.b32.xlu0 %v1667_v18, %s2597_s3 }
0x20ec   :  { %v551_v22 = vpop.permute.xlu1 %550 }
0x20ed   :  { %553 = vst.msk [vmem:[#allocation2 + $0x28] sm:$0xff] %vm326_vm8, %v551_v22 }
0x20f0   :  { %v886_v23 = vpop.permute.xlu1 %885 }
0x20f1   :  { %888 = vst.msk [vmem:[#allocation2 + $0x28] sm:$0xff] %vm64_vm1, %v886_v23 }
0x20f8   :  { %v1124_v15 = vld [vmem:[#allocation2 + $0x28] sm:$0xff] }
0x20f9   :  { %2369 = vmatmul.mubr.msk.f32.gmra.mrb[16].mxu0 %vm1130_vm9, %v1124_v15 }
0x215d   :  { %v1670_v20 = vpop.permute.xlu0 %1669 }
0x215e   :  { %2407 = vmatmul.mubr.msk.f32.vlgmr.msra.gmra.mrb[20].mxu1 %vm64_vm1, %v1670_v20 }
0x215f   :  { %2506 = vmatpush3.bf16.msk.msra.mxu1 %vm2680_vm3, %v2932_v9  ;;  %2420 = vmatprep.mubr.msk.f32.mxu1 %vm2591_vm4, %v2592_v8 }
0x2160   :  { %2511 = vmatprep.subr.bf16.mxu1 %v2590_v3 }
0x21cc   :  { %v2370_v7 = vpop.f32.mrb[16].mxu0 }
0x21cd   :  { %v1241_v10 = vpop.f32.mrb[17].mxu0 }
0x2231   :  { %v1739_v24 = vpop.f32.mrb[20].mxu1 }
0x2232   :  { %v1743_v26 = vadd.f32 %v1739_v24, %v1241_v10  ;;  %v2408_v27 = vpop.f32.mrb[21].mxu1 }
0x2234   :  { %v1744_v28 = vadd.f32 %v2974_v33, %v1743_v26 }
0x2236   :  { %v1745_v29 = vmul.f32 %v1744_v28, %v2731_v21 }
0x2238   :  { %2573 = vtanh.f32 %v1745_v29 }
0x2242   :  { %v2574_v40 = vpop.eup %2573 }
0x2243   :  { %v1747_v30 = vmul.f32 %v2574_v40, %v2731_v21 }
0x2245   :  { %v1748_v31 = vadd.f32 %v1747_v30, %v2735_v25 }
0x2247   :  { %1751 = vrot.lane.b32.xlu1 %v1748_v31, %s2594_s26  ;;  %v1749_v3 = vmul.f32 %v1748_v31, %v1661_v6 }
0x22b9   :  { %v1752_v62 = vpop.permute.xlu1 %1751 }
0x22ba   :  { %v1754_v32 = vmul.f32 %v1752_v62, %v1748_v31 }
0x22bc   :  { %1756 = vrot.lane.b32.xlu0 %v1754_v32, %s2595_s28 }
0x22c0   :  { %437 = vrot.lane.b32.xlu0 %v2912_v1, %s2594_s26 }
0x22c4   :  { %998 = vrot.lane.b32.xlu0 %v2952_v19, %s2597_s3 }
0x232e   :  { %v1757_v34 = vpop.permute.xlu0 %1756 }
0x232f   :  { %v1759_v35 = vadd.f32 %v1757_v34, %v1749_v3 }
0x2331   :  { %2575 = vtanh.f32 %v1759_v35 }
0x2332   :  { %v438_v36 = vpop.permute.xlu0 %437 }
0x2333   :  { %440 = vst.msk [vmem:[#allocation2 + $0x30] sm:$0xff] %vm326_vm8, %v438_v36 }
0x2336   :  { %v999_v38 = vpop.permute.xlu0 %998 }
0x2337   :  { %1001 = vst.msk [vmem:[#allocation2 + $0x30] sm:$0xff] %vm64_vm1, %v999_v38 }
0x233b   :  { %v2576_v39 = vpop.eup %2575 }
0x233c   :  { %1762 = vrot.lane.b32.xlu1 %v2576_v39, %s2596_s29 }
0x233e   :  { %v1125_v41 = vld [vmem:[#allocation2 + $0x30] sm:$0xff] }
0x233f   :  { %2371 = vmatprep.mubr.msk.f32.mxu0 %vm1130_vm9, %v1125_v41 }
0x2340   :  { %323 = vrot.lane.b32.xlu1 %v2902_v60, %s2594_s26 }
0x2344   :  { %1111 = vrot.lane.b32.xlu1 %v2943_v16, %s2597_s3 }
0x23ae   :  { %v1763_v1 = vpop.permute.xlu1 %1762 }
0x23af   :  { %v1765_v19 = vmul.f32 %v1763_v1, %v1748_v31 }
0x23b1   :  { %1767 = vrot.lane.b32.xlu0 %v1765_v19, %s2597_s3 }
0x23b2   :  { %v324_v42 = vpop.permute.xlu1 %323 }
0x23b3   :  { %327 = vst.msk [vmem:[#allocation2 + $0x38] sm:$0xff] %vm326_vm8, %v324_v42  ;;  %v2209_v42 = vld [vmem:[%s3178_s13] ss:$0 sm:$0xff] }
0x23b6   :  { %v1112_v44 = vpop.permute.xlu1 %1111 }
0x23b7   :  { %1114 = vst.msk [vmem:[#allocation2 + $0x38] sm:$0xff] %vm64_vm1, %v1112_v44 }
0x23be   :  { %v1126_v45 = vld [vmem:[#allocation2 + $0x38] sm:$0xff] }
0x23bf   :  { %2372 = vmatmul.mubr.msk.f32.gmra.mrb[18].mxu0 %vm1130_vm9, %v1126_v45 }
0x23c0   :  { %2413 = vmatprep.mubr.msk.f32.mxu0 %vm2591_vm4, %v2592_v8 }
0x2423   :  { %v1768_v60 = vpop.permute.xlu0 %1767 }
0x2424   :  { %2414 = vmatmul.mubr.msk.f32.vlgmr.msra.gmra.mrb[20].mxu0 %vm64_vm1, %v1768_v60 }
0x2425   :  { %2510 = vmatpush3.bf16.msk.msra.mxu0 %vm2680_vm3, %v2932_v9  ;;  %2427 = vmatprep.mubr.msk.f32.mxu0 %vm2591_vm4, %v2592_v8 }
0x2492   :  { %v2373_v16 = vpop.f32.mrb[18].mxu0 }
0x2493   :  { %v1251_v46 = vpop.f32.mrb[19].mxu0 }
0x24f7   :  { %v1837_v47 = vpop.f32.mrb[20].mxu0 }
0x24f8   :  { %v1841_v48 = vadd.f32 %v2370_v7, %v1837_v47  ;;  %v2415_v49 = vpop.f32.mrb[21].mxu0 }
0x24fa   :  { %v1842_v50 = vadd.f32 %v2974_v33, %v1841_v48 }
0x24fc   :  { %v1843_v51 = vmul.f32 %v1842_v50, %v2731_v21 }
0x24fe   :  { %2577 = vtanh.f32 %v1843_v51 }
0x2508   :  { %v2578_v43 = vpop.eup %2577 }
0x2509   :  { %v1845_v53 = vmul.f32 %v2578_v43, %v2731_v21 }
0x250b   :  { %v1846_v17 = vadd.f32 %v1845_v53, %v2735_v25 }
0x250d   :  { %1849 = vrot.lane.b32.xlu1 %v1846_v17, %s2594_s26  ;;  %v1847_v55 = vmul.f32 %v1846_v17, %v1759_v35 }
0x257f   :  { %v1850_v9 = vpop.permute.xlu1 %1849 }
0x2580   :  { %v1852_v54 = vmul.f32 %v1850_v9, %v1846_v17 }
0x2582   :  { %1854 = vrot.lane.b32.xlu0 %v1852_v54, %s2595_s28 }
0x25f4   :  { %v1855_v57 = vpop.permute.xlu0 %1854 }
0x25f5   :  { %v1857_v58 = vadd.f32 %v1855_v57, %v1847_v55 }
0x25f7   :  { %2579 = vtanh.f32 %v1857_v58 }
0x2601   :  { %v2580_v59 = vpop.eup %2579 }
0x2602   :  { %1860 = vrot.lane.b32.xlu1 %v2580_v59, %s2596_s29 }
0x2674   :  { %v1861_v61 = vpop.permute.xlu1 %1860 }
0x2675   :  { %v1863_v63 = vmul.f32 %v1861_v61, %v1846_v17 }
0x2677   :  { %1865 = vrot.lane.b32.xlu0 %v1863_v63, %s2597_s3 }
0x26e9   :  { %v1866_v0 = vpop.permute.xlu0 %1865 }
0x26ea   :  { %2421 = vmatmul.mubr.msk.f32.vlgmr.msra.gmra.mrb[22].mxu1 %vm64_vm1, %v1866_v0 }
0x26eb   :  { %2434 = vmatprep.mubr.msk.f32.mxu1 %vm2591_vm4, %v2592_v8 }
0x27bd   :  { %v1935_v37 = vpop.f32.mrb[22].mxu1 }
0x27be   :  { %v1939_v4 = vadd.f32 %v1935_v37, %v1251_v46  ;;  %v2422_v5 = vpop.f32.mrb[23].mxu1 }
0x27c0   :  { %v1940_v6 = vadd.f32 %v2974_v33, %v1939_v4 }
0x27c2   :  { %v1941_v56 = vmul.f32 %v1940_v6, %v2731_v21 }
0x27c4   :  { %2581 = vtanh.f32 %v1941_v56 }
0x27ce   :  { %v2582_v11 = vpop.eup %2581 }
0x27cf   :  { %v1943_v12 = vmul.f32 %v2582_v11, %v2731_v21 }
0x27d1   :  { %v1944_v13 = vadd.f32 %v1943_v12, %v2735_v25 }
0x27d3   :  { %1947 = vrot.lane.b32.xlu1 %v1944_v13, %s2594_s26  ;;  %v1945_v8 = vmul.f32 %v1944_v13, %v1857_v58 }
0x2845   :  { %v1948_v14 = vpop.permute.xlu1 %1947 }
0x2846   :  { %v1950_v18 = vmul.f32 %v1948_v14, %v1944_v13 }
0x2848   :  { %1952 = vrot.lane.b32.xlu0 %v1950_v18, %s2595_s28 }
0x28ba   :  { %v1953_v22 = vpop.permute.xlu0 %1952 }
0x28bb   :  { %v1955_v23 = vadd.f32 %v1953_v22, %v1945_v8 }
0x28bd   :  { %2583 = vtanh.f32 %v1955_v23 }
0x28c7   :  { %v2584_v15 = vpop.eup %2583 }
0x28c8   :  { %1958 = vrot.lane.b32.xlu1 %v2584_v15, %s2596_s29 }
0x293a   :  { %v1959_v20 = vpop.permute.xlu1 %1958 }
0x293b   :  { %v1961_v7 = vmul.f32 %v1959_v20, %v1944_v13 }
0x293d   :  { %1963 = vrot.lane.b32.xlu0 %v1961_v7, %s2597_s3 }
0x29af   :  { %v1964_v10 = vpop.permute.xlu0 %1963 }
0x29b0   :  { %2428 = vmatmul.mubr.msk.f32.vlgmr.msra.gmra.mrb[22].mxu0 %vm64_vm1, %v1964_v10 }
0x2a83   :  { %v2033_v24 = vpop.f32.mrb[22].mxu0 }
0x2a84   :  { %v2037_v26 = vadd.f32 %v2373_v16, %v2033_v24  ;;  %v2429_v27 = vpop.f32.mrb[23].mxu0 }
0x2a86   :  { %v2038_v28 = vadd.f32 %v2974_v33, %v2037_v26  ;;  %v2068_v33 = vld [vmem:[%s3177_s12] sm:$0xff] }
0x2a88   :  { %v2039_v29 = vmul.f32 %v2038_v28, %v2731_v21 }
0x2a8a   :  { %2585 = vtanh.f32 %v2039_v29 }
0x2a94   :  { %v2586_v40 = vpop.eup %2585 }
0x2a95   :  { %v2041_v30 = vmul.f32 %v2586_v40, %v2731_v21  ;;  %v2069_v21 = vld [vmem:[%s3177_s12 + $0x8] sm:$0xf] }
0x2a96   :  { %v2512_v36 = vpack.c.bf16 %v2069_v21, %v2068_v33 }
0x2a97   :  { %v2042_v31 = vadd.f32 %v2041_v30, %v2735_v25 }
0x2a98   :  { %2514 = vmatpush3.bf16.msk.msra.mxu1 %vm2680_vm3, %v2512_v36 }
0x2a99   :  { %2045 = vrot.lane.b32.xlu1 %v2042_v31, %s2594_s26  ;;  %v2043_v3 = vmul.f32 %v2042_v31, %v1955_v23 }
0x2b0b   :  { %v2046_v62 = vpop.permute.xlu1 %2045 }
0x2b0c   :  { %v2048_v32 = vmul.f32 %v2046_v62, %v2042_v31 }
0x2b0e   :  { %2050 = vrot.lane.b32.xlu0 %v2048_v32, %s2595_s28 }
0x2b80   :  { %v2051_v34 = vpop.permute.xlu0 %2050 }
0x2b81   :  { %v2053_v35 = vadd.f32 %v2051_v34, %v2043_v3 }
0x2b83   :  { %2587 = vtanh.f32 %v2053_v35 }
0x2b8d   :  { %v2588_v25 = vpop.eup %2587 }
0x2b8e   :  { %2056 = vrot.lane.b32.xlu1 %v2588_v25, %s2596_s29 }
0x2c00   :  { %v2057_v38 = vpop.permute.xlu1 %2056 }
0x2c01   :  { %v2059_v39 = vmul.f32 %v2057_v38, %v2042_v31 }
0x2c03   :  { %2061 = vrot.lane.b32.xlu0 %v2059_v39, %s2597_s3 }
0x2c75   :  { %v2062_v41 = vpop.permute.xlu0 %2061 }
0x2c76   :  { %v2066_v1 = vsel %vm2065_vm10, %v2062_v41, %v2984_v52 }
0x2c77   :  { %v2067_v19 = vmax.f32 %v2066_v1, 0.0 }
0x2c79   :  { %2435 = vmatmul.mubr.msk.f32.vlgmr.msra.gmra.mrb[24].mxu1 %vm64_vm1, %v2067_v19 }
0x2d4c   :  { %v2149_v2 = vpop.f32.mrb[24].mxu1 }
0x2d4d   :  { %v2150_v44 = vadd.f32 %v2209_v42, %v2149_v2  ;;  %v2436_v45 = vpop.f32.mrb[25].mxu1 }
0x2d4f   :  { %2153 = vst.msk [vmem:[%s3179_s14] sm:$0xff] %vm2065_vm10, %v2150_v44 }

</bundles_post_ra>
